<compile_context>
chip_gen: v6e
topology: v6e:2x2x1
jax: 0.10.0
libtpu: 0.0.40
codegen_flags: <defaults>
</compile_context>

<pallas_src>
import jax
import jax.numpy as jnp
from jax.experimental import pallas as pl
from jax.experimental.pallas import tpu as pltpu

# ---------------- small, deterministic shapes ----------------
B, NPTS = 4, 16          # batch, number of points per cloud
C_IN = 3                 # xyz
C_PAD = 8                # zero-pad input channels to 8 (exact: padded weight rows are 0)
H1, H2 = 16, 32          # backbone hidden channels
FEAT = 64                # backbone.output_dim
PROJ_H = PROJ_OUT = 64   # projection_MLP hidden == out (layer3 BN is BatchNorm1d(hidden_dim))
PRED_H = 32              # prediction_MLP hidden
BN_EPS = 1e-5
COS_EPS = 1e-8

ROWS_BB = 2 * B * NPTS   # 128 backbone rows (both views)
ROWS_HD = 2 * B          # 8 head rows (both views)


# ---------------- the Pallas kernel (whole forward pass) ----------------
def simsiam_kernel(
    x_ref,                                                   # (128, C_PAD) both views, flattened
    w1_ref, b1_ref, w2_ref, b2_ref, w3_ref, b3_ref,          # backbone (1x1 convs)
    wp1_ref, bp1_ref, wp2_ref, bp2_ref, wp3_ref, bp3_ref,    # projector
    wq1_ref, bq1_ref, wq2_ref, bq2_ref,                      # predictor
    loss_ref,                                                # (1, 1) output
):
    def linear(x, w_ref, b_ref):
        # weights/biases loaded exactly once per layer (single batched pass)
        return jnp.dot(x, w_ref[...], preferred_element_type=jnp.float32) + b_ref[...]

    def bn_backbone(x):
        # Per-view BN over the 64-row segments of the 128-row slab.
        # (128,C)->(2,64,C) splits sublanes at a multiple of 8 -> layout preserving.
        r, c = x.shape
        x3 = x.reshape(2, r // 2, c)
        mu = jnp.mean(x3, axis=1, keepdims=True)            # (2,1,c)
        msq = jnp.mean(x3 * x3, axis=1, keepdims=True)      # fused single sweep
        var = jnp.maximum(msq - mu * mu, 0.0)
        y = (x3 - mu) * jax.lax.rsqrt(var + BN_EPS)
        return y.reshape(r, c)

    def bn_head(x, m, mo):
        # Per-view BN for the (2B, D) head activations via masked segment stats
        # (avoids non-tile-aligned reshapes on an 8-row tensor).
        inv_n = 1.0 / B
        xm = x * m                                           # view-1 rows, 0 elsewhere
        xo = x - xm                                          # view-2 rows, 0 elsewhere
        mu1 = jnp.sum(xm, axis=0, keepdims=True) * inv_n     # (1, D)
        mu2 = jnp.sum(xo, axis=0, keepdims=True) * inv_n
        sq1 = jnp.sum(xm * x, axis=0, keepdims=True) * inv_n
        sq2 = jnp.sum(xo * x, axis=0, keepdims=True) * inv_n
        mu = m * mu1 + mo * mu2                              # row-selected mean (2B, D)
        var = m * jnp.maximum(sq1 - mu1 * mu1, 0.0) + mo * jnp.maximum(sq2 - mu2 * mu2, 0.0)
        return (x - mu) * jax.lax.rsqrt(var + BN_EPS)

    # ---------------- backbone: shared per-point MLP + global max-pool ----------------
    h = x_ref[...]                                           # (128, C_PAD)
    h = jnp.maximum(bn_backbone(linear(h, w1_ref, b1_ref)), 0.0)
    h = jnp.maximum(bn_backbone(linear(h, w2_ref, b2_ref)), 0.0)
    h = bn_backbone(linear(h, w3_ref, b3_ref))               # (128, FEAT), no ReLU before pool
    # global max-pool over the NPTS points of each cloud (reshape + axis reduce, no slices)
    feat = jnp.max(h.reshape(ROWS_HD, NPTS, FEAT), axis=1)   # (2B, FEAT): [view1 clouds; view2 clouds]

    # per-view row mask for the head BNs (hoisted, computed once)
    ridx = jax.lax.broadcasted_iota(jnp.int32, (ROWS_HD, 1), 0)
    m = (ridx < B).astype(jnp.float32)                       # 1.0 for view-1 rows
    mo = 1.0 - m

    # ---------------- projector (Linear+BN+ReLU, Linear+BN+ReLU, Linear+BN) ----------------
    h = jnp.maximum(bn_head(linear(feat, wp1_ref, bp1_ref), m, mo), 0.0)
    h = jnp.maximum(bn_head(linear(h, wp2_ref, bp2_ref), m, mo), 0.0)
    z = bn_head(linear(h, wp3_ref, bp3_ref), m, mo)          # (2B, PROJ_OUT) = [z1; z2]

    # ---------------- predictor (Linear+BN+ReLU, Linear) ----------------
    h = jnp.maximum(bn_head(linear(z, wq1_ref, bq1_ref), m, mo), 0.0)
    p = linear(h, wq2_ref, bq2_ref)                          # (2B, PROJ_OUT) = [p1; p2]

    # ---------------- loss: 0.5*D(p1,z2) + 0.5*D(p2,z1) ----------------
    # pair p-rows with the other view's z-rows via a sublane rotate (XLU)
    z_sw = pltpu.roll(z, shift=B, axis=0)                    # rows: [z2; z1]
    dot = jnp.sum(p * z_sw, axis=-1, keepdims=True)          # (2B, 1)
    pn2 = jnp.sum(p * p, axis=-1, keepdims=True)
    zn2 = jnp.sum(z_sw * z_sw, axis=-1, keepdims=True)
    inv = jax.lax.rsqrt(jnp.maximum(pn2 * zn2, COS_EPS * COS_EPS))   # EUP rsqrt, == 1/max(|p||z|,eps)
    cos = dot * inv                                          # (2B, 1)
    # mean over both B-row groups == mean over all 2B rows (equal group sizes)
    loss_ref[...] = -jnp.sum(cos, axis=0, keepdims=True) * (0.5 / B)


# ---------------- wrapper ----------------
def simsiam_forward(x1, x2, params):
    """x1, x2: (B, NPTS, C_IN) float32 point clouds. Returns scalar loss."""
    # host-side layout plumbing: concat views, zero-pad channels (exact: padded
    # weight rows are zero too), flatten to a (2*B*NPTS, C_PAD) slab.
    pad = C_PAD - C_IN
    x = jnp.concatenate([x1, x2], axis=0)                    # (2B, NPTS, C_IN)
    x = jnp.pad(x, ((0, 0), (0, 0), (0, pad)))               # (2B, NPTS, C_PAD)
    x = x.reshape(ROWS_BB, C_PAD)                            # (128, 8)

    args = [x] + list(params)
    vmem = pl.BlockSpec(memory_space=pltpu.MemorySpace.VMEM)
    out = pl.pallas_call(
        simsiam_kernel,
        out_shape=jax.ShapeDtypeStruct((1, 1), jnp.float32),
        in_specs=[vmem] * len(args),
        out_specs=vmem,
    )(*args)
    return out[0, 0]


# ---------------- deterministic parameter init ----------------
def init_params(key):
    def lin(k, din, dout, pad_in=None):
        kw, kb = jax.random.split(k)
        w = 0.05 * jax.random.normal(kw, (din, dout), jnp.float32)
        b = 0.05 * jax.random.normal(kb, (1, dout), jnp.float32)
        if pad_in is not None and pad_in > din:
            w = jnp.pad(w, ((0, pad_in - din), (0, 0)))  # zero rows for padded channels
        return w, b

    ks = jax.random.split(key, 8)
    w1, b1 = lin(ks[0], C_IN, H1, pad_in=C_PAD)
    w2, b2 = lin(ks[1], H1, H2)
    w3, b3 = lin(ks[2], H2, FEAT)
    wp1, bp1 = lin(ks[3], FEAT, PROJ_H)
    wp2, bp2 = lin(ks[4], PROJ_H, PROJ_H)
    wp3, bp3 = lin(ks[5], PROJ_H, PROJ_OUT)
    wq1, bq1 = lin(ks[6], PROJ_OUT, PRED_H)
    wq2, bq2 = lin(ks[7], PRED_H, PROJ_OUT)
    return (w1, b1, w2, b2, w3, b3,
            wp1, bp1, wp2, bp2, wp3, bp3,
            wq1, bq1, wq2, bq2)


# ---------------- pure-JAX reference (per-view, PyTorch-style semantics) ----------------
def reference_forward(x1, x2, params):
    (w1, b1, w2, b2, w3, b3, wp1, bp1, wp2, bp2, wp3, bp3, wq1, bq1, wq2, bq2) = params

    def bn(x):
        mu = jnp.mean(x, axis=0, keepdims=True)
        var = jnp.mean((x - mu) ** 2, axis=0, keepdims=True)
        return (x - mu) / jnp.sqrt(var + BN_EPS)

    def backbone(x):
        pad = C_PAD - C_IN
        xp = jnp.pad(x, ((0, 0), (0, 0), (0, pad)))
        h = xp.reshape(B * NPTS, C_PAD)
        h = jnp.maximum(bn(h @ w1 + b1), 0.0)
        h = jnp.maximum(bn(h @ w2 + b2), 0.0)
        h = bn(h @ w3 + b3)
        return jnp.max(h.reshape(B, NPTS, FEAT), axis=1)

    def projector(z):
        h = jnp.maximum(bn(z @ wp1 + bp1), 0.0)
        h = jnp.maximum(bn(h @ wp2 + bp2), 0.0)
        return bn(h @ wp3 + bp3)

    def predictor(z):
        return jnp.maximum(bn(z @ wq1 + bq1), 0.0) @ wq2 + bq2

    def ncm(p, z):
        dot = jnp.sum(p * z, axis=-1)
        denom = jnp.maximum(jnp.linalg.norm(p, axis=-1) * jnp.linalg.norm(z, axis=-1), COS_EPS)
        return -jnp.mean(dot / denom)

    z1, z2 = projector(backbone(x1)), projector(backbone(x2))
    p1, p2 = predictor(z1), predictor(z2)
    return 0.5 * ncm(p1, z2) + 0.5 * ncm(p2, z1)


if __name__ == "__main__":
    key = jax.random.PRNGKey(0)
    kx1, kx2, kp = jax.random.split(key, 3)
    x1 = jax.random.normal(kx1, (B, NPTS, C_IN), jnp.float32)
    x2 = jax.random.normal(kx2, (B, NPTS, C_IN), jnp.float32)
    params = init_params(kp)

    loss = simsiam_forward(x1, x2, params)
    loss = jax.block_until_ready(loss)

    ref = reference_forward(x1, x2, params)
    assert jnp.allclose(loss, ref, rtol=1e-3, atol=1e-3), (loss, ref)
    print("KERNEL_OK")
</pallas_src>

<mosaic_0001>
module attributes {stable_mosaic.version = 11 : i64} {
  func.func @simsiam_kernel(%arg0: memref<128x8xf32, #tpu.memory_space<vmem>>, %arg1: memref<8x16xf32, #tpu.memory_space<vmem>>, %arg2: memref<1x16xf32, #tpu.memory_space<vmem>>, %arg3: memref<16x32xf32, #tpu.memory_space<vmem>>, %arg4: memref<1x32xf32, #tpu.memory_space<vmem>>, %arg5: memref<32x64xf32, #tpu.memory_space<vmem>>, %arg6: memref<1x64xf32, #tpu.memory_space<vmem>>, %arg7: memref<64x64xf32, #tpu.memory_space<vmem>>, %arg8: memref<1x64xf32, #tpu.memory_space<vmem>>, %arg9: memref<64x64xf32, #tpu.memory_space<vmem>>, %arg10: memref<1x64xf32, #tpu.memory_space<vmem>>, %arg11: memref<64x64xf32, #tpu.memory_space<vmem>>, %arg12: memref<1x64xf32, #tpu.memory_space<vmem>>, %arg13: memref<64x32xf32, #tpu.memory_space<vmem>>, %arg14: memref<1x32xf32, #tpu.memory_space<vmem>>, %arg15: memref<32x64xf32, #tpu.memory_space<vmem>>, %arg16: memref<1x64xf32, #tpu.memory_space<vmem>>, %arg17: memref<1x1xf32, #tpu.memory_space<vmem>>) attributes {dimension_semantics = [], scalar_prefetch = 0 : i64, scratch_operands = 0 : i64, tpu.core_type = #tpu.core_type<tc>} {
    %c0 = arith.constant 0 : index
    %c0_0 = arith.constant 0 : index
    %0 = vector.load %arg0[%c0, %c0_0] : memref<128x8xf32, #tpu.memory_space<vmem>>, vector<128x8xf32>
    %c0_1 = arith.constant 0 : index
    %c0_2 = arith.constant 0 : index
    %1 = vector.load %arg1[%c0_1, %c0_2] : memref<8x16xf32, #tpu.memory_space<vmem>>, vector<8x16xf32>
    %cst = arith.constant dense<0.000000e+00> : vector<128x16xf32>
    %2 = tpu.matmul %0, %1, %cst {dimension_numbers = #tpu.dot_dimension_numbers<[1], [0], [0], [1], [0, 0, 1, 1], [], []>} : vector<128x8xf32>, vector<8x16xf32>, vector<128x16xf32> -> vector<128x16xf32>
    %c0_3 = arith.constant 0 : index
    %c0_4 = arith.constant 0 : index
    %3 = vector.load %arg2[%c0_3, %c0_4] : memref<1x16xf32, #tpu.memory_space<vmem>>, vector<1x16xf32>
    %4 = vector.broadcast %3 : vector<1x16xf32> to vector<128x16xf32>
    %5 = arith.addf %2, %4 : vector<128x16xf32>
    %6 = vector.shape_cast %5 : vector<128x16xf32> to vector<2x64x16xf32>
    %cst_5 = arith.constant dense<0.000000e+00> : vector<2x16xf32>
    %7 = vector.multi_reduction <add>, %6, %cst_5 [1] : vector<2x64x16xf32> to vector<2x16xf32>
    %8 = vector.shape_cast %7 : vector<2x16xf32> to vector<2x1x16xf32>
    %cst_6 = arith.constant 6.400000e+01 : f32
    %9 = vector.broadcast %cst_6 : f32 to vector<2x1x16xf32>
    %10 = arith.divf %8, %9 : vector<2x1x16xf32>
    %11 = arith.mulf %6, %6 : vector<2x64x16xf32>
    %cst_7 = arith.constant dense<0.000000e+00> : vector<2x16xf32>
    %12 = vector.multi_reduction <add>, %11, %cst_7 [1] : vector<2x64x16xf32> to vector<2x16xf32>
    %13 = vector.shape_cast %12 : vector<2x16xf32> to vector<2x1x16xf32>
    %cst_8 = arith.constant 6.400000e+01 : f32
    %14 = vector.broadcast %cst_8 : f32 to vector<2x1x16xf32>
    %15 = arith.divf %13, %14 : vector<2x1x16xf32>
    %16 = arith.mulf %10, %10 : vector<2x1x16xf32>
    %17 = arith.subf %15, %16 : vector<2x1x16xf32>
    %cst_9 = arith.constant 0.000000e+00 : f32
    %18 = vector.broadcast %cst_9 : f32 to vector<2x1x16xf32>
    %19 = arith.maximumf %17, %18 : vector<2x1x16xf32>
    %20 = vector.broadcast %10 : vector<2x1x16xf32> to vector<2x64x16xf32>
    %21 = arith.subf %6, %20 : vector<2x64x16xf32>
    %cst_10 = arith.constant 9.99999974E-6 : f32
    %22 = vector.broadcast %cst_10 : f32 to vector<2x1x16xf32>
    %23 = arith.addf %19, %22 : vector<2x1x16xf32>
    %24 = math.rsqrt %23 : vector<2x1x16xf32>
    %25 = vector.broadcast %24 : vector<2x1x16xf32> to vector<2x64x16xf32>
    %26 = arith.mulf %21, %25 : vector<2x64x16xf32>
    %27 = vector.shape_cast %26 : vector<2x64x16xf32> to vector<128x16xf32>
    %cst_11 = arith.constant 0.000000e+00 : f32
    %28 = vector.broadcast %cst_11 : f32 to vector<128x16xf32>
    %29 = arith.maximumf %27, %28 : vector<128x16xf32>
    %c0_12 = arith.constant 0 : index
    %c0_13 = arith.constant 0 : index
    %30 = vector.load %arg3[%c0_12, %c0_13] : memref<16x32xf32, #tpu.memory_space<vmem>>, vector<16x32xf32>
    %cst_14 = arith.constant dense<0.000000e+00> : vector<128x32xf32>
    %31 = tpu.matmul %29, %30, %cst_14 {dimension_numbers = #tpu.dot_dimension_numbers<[1], [0], [0], [1], [0, 0, 1, 1], [], []>} : vector<128x16xf32>, vector<16x32xf32>, vector<128x32xf32> -> vector<128x32xf32>
    %c0_15 = arith.constant 0 : index
    %c0_16 = arith.constant 0 : index
    %32 = vector.load %arg4[%c0_15, %c0_16] : memref<1x32xf32, #tpu.memory_space<vmem>>, vector<1x32xf32>
    %33 = vector.broadcast %32 : vector<1x32xf32> to vector<128x32xf32>
    %34 = arith.addf %31, %33 : vector<128x32xf32>
    %35 = vector.shape_cast %34 : vector<128x32xf32> to vector<2x64x32xf32>
    %cst_17 = arith.constant dense<0.000000e+00> : vector<2x32xf32>
    %36 = vector.multi_reduction <add>, %35, %cst_17 [1] : vector<2x64x32xf32> to vector<2x32xf32>
    %37 = vector.shape_cast %36 : vector<2x32xf32> to vector<2x1x32xf32>
    %cst_18 = arith.constant 6.400000e+01 : f32
    %38 = vector.broadcast %cst_18 : f32 to vector<2x1x32xf32>
    %39 = arith.divf %37, %38 : vector<2x1x32xf32>
    %40 = arith.mulf %35, %35 : vector<2x64x32xf32>
    %cst_19 = arith.constant dense<0.000000e+00> : vector<2x32xf32>
    %41 = vector.multi_reduction <add>, %40, %cst_19 [1] : vector<2x64x32xf32> to vector<2x32xf32>
    %42 = vector.shape_cast %41 : vector<2x32xf32> to vector<2x1x32xf32>
    %cst_20 = arith.constant 6.400000e+01 : f32
    %43 = vector.broadcast %cst_20 : f32 to vector<2x1x32xf32>
    %44 = arith.divf %42, %43 : vector<2x1x32xf32>
    %45 = arith.mulf %39, %39 : vector<2x1x32xf32>
    %46 = arith.subf %44, %45 : vector<2x1x32xf32>
    %cst_21 = arith.constant 0.000000e+00 : f32
    %47 = vector.broadcast %cst_21 : f32 to vector<2x1x32xf32>
    %48 = arith.maximumf %46, %47 : vector<2x1x32xf32>
    %49 = vector.broadcast %39 : vector<2x1x32xf32> to vector<2x64x32xf32>
    %50 = arith.subf %35, %49 : vector<2x64x32xf32>
    %cst_22 = arith.constant 9.99999974E-6 : f32
    %51 = vector.broadcast %cst_22 : f32 to vector<2x1x32xf32>
    %52 = arith.addf %48, %51 : vector<2x1x32xf32>
    %53 = math.rsqrt %52 : vector<2x1x32xf32>
    %54 = vector.broadcast %53 : vector<2x1x32xf32> to vector<2x64x32xf32>
    %55 = arith.mulf %50, %54 : vector<2x64x32xf32>
    %56 = vector.shape_cast %55 : vector<2x64x32xf32> to vector<128x32xf32>
    %cst_23 = arith.constant 0.000000e+00 : f32
    %57 = vector.broadcast %cst_23 : f32 to vector<128x32xf32>
    %58 = arith.maximumf %56, %57 : vector<128x32xf32>
    %c0_24 = arith.constant 0 : index
    %c0_25 = arith.constant 0 : index
    %59 = vector.load %arg5[%c0_24, %c0_25] : memref<32x64xf32, #tpu.memory_space<vmem>>, vector<32x64xf32>
    %cst_26 = arith.constant dense<0.000000e+00> : vector<128x64xf32>
    %60 = tpu.matmul %58, %59, %cst_26 {dimension_numbers = #tpu.dot_dimension_numbers<[1], [0], [0], [1], [0, 0, 1, 1], [], []>} : vector<128x32xf32>, vector<32x64xf32>, vector<128x64xf32> -> vector<128x64xf32>
    %c0_27 = arith.constant 0 : index
    %c0_28 = arith.constant 0 : index
    %61 = vector.load %arg6[%c0_27, %c0_28] : memref<1x64xf32, #tpu.memory_space<vmem>>, vector<1x64xf32>
    %62 = vector.broadcast %61 : vector<1x64xf32> to vector<128x64xf32>
    %63 = arith.addf %60, %62 : vector<128x64xf32>
    %64 = vector.shape_cast %63 : vector<128x64xf32> to vector<2x64x64xf32>
    %cst_29 = arith.constant dense<0.000000e+00> : vector<2x64xf32>
    %65 = vector.multi_reduction <add>, %64, %cst_29 [1] : vector<2x64x64xf32> to vector<2x64xf32>
    %66 = vector.shape_cast %65 : vector<2x64xf32> to vector<2x1x64xf32>
    %cst_30 = arith.constant 6.400000e+01 : f32
    %67 = vector.broadcast %cst_30 : f32 to vector<2x1x64xf32>
    %68 = arith.divf %66, %67 : vector<2x1x64xf32>
    %69 = arith.mulf %64, %64 : vector<2x64x64xf32>
    %cst_31 = arith.constant dense<0.000000e+00> : vector<2x64xf32>
    %70 = vector.multi_reduction <add>, %69, %cst_31 [1] : vector<2x64x64xf32> to vector<2x64xf32>
    %71 = vector.shape_cast %70 : vector<2x64xf32> to vector<2x1x64xf32>
    %cst_32 = arith.constant 6.400000e+01 : f32
    %72 = vector.broadcast %cst_32 : f32 to vector<2x1x64xf32>
    %73 = arith.divf %71, %72 : vector<2x1x64xf32>
    %74 = arith.mulf %68, %68 : vector<2x1x64xf32>
    %75 = arith.subf %73, %74 : vector<2x1x64xf32>
    %cst_33 = arith.constant 0.000000e+00 : f32
    %76 = vector.broadcast %cst_33 : f32 to vector<2x1x64xf32>
    %77 = arith.maximumf %75, %76 : vector<2x1x64xf32>
    %78 = vector.broadcast %68 : vector<2x1x64xf32> to vector<2x64x64xf32>
    %79 = arith.subf %64, %78 : vector<2x64x64xf32>
    %cst_34 = arith.constant 9.99999974E-6 : f32
    %80 = vector.broadcast %cst_34 : f32 to vector<2x1x64xf32>
    %81 = arith.addf %77, %80 : vector<2x1x64xf32>
    %82 = math.rsqrt %81 : vector<2x1x64xf32>
    %83 = vector.broadcast %82 : vector<2x1x64xf32> to vector<2x64x64xf32>
    %84 = arith.mulf %79, %83 : vector<2x64x64xf32>
    %85 = vector.shape_cast %84 : vector<2x64x64xf32> to vector<128x64xf32>
    %86 = vector.shape_cast %85 : vector<128x64xf32> to vector<8x16x64xf32>
    %cst_35 = arith.constant dense<0xFF800000> : vector<8x64xf32>
    %87 = vector.multi_reduction <maximumf>, %86, %cst_35 [1] : vector<8x16x64xf32> to vector<8x64xf32>
    %88 = tpu.iota {dimensions = array<i32: 0>} : vector<8x1xi32>
    %c4_i32 = arith.constant 4 : i32
    %89 = vector.broadcast %c4_i32 : i32 to vector<8x1xi32>
    %90 = arith.cmpi slt, %88, %89 : vector<8x1xi32>
    %91 = arith.extui %90 : vector<8x1xi1> to vector<8x1xi32>
    %92 = arith.sitofp %91 : vector<8x1xi32> to vector<8x1xf32>
    %cst_36 = arith.constant 1.000000e+00 : f32
    %93 = vector.broadcast %cst_36 : f32 to vector<8x1xf32>
    %94 = arith.subf %93, %92 : vector<8x1xf32>
    %c0_37 = arith.constant 0 : index
    %c0_38 = arith.constant 0 : index
    %95 = vector.load %arg7[%c0_37, %c0_38] : memref<64x64xf32, #tpu.memory_space<vmem>>, vector<64x64xf32>
    %cst_39 = arith.constant dense<0.000000e+00> : vector<8x64xf32>
    %96 = tpu.matmul %87, %95, %cst_39 {dimension_numbers = #tpu.dot_dimension_numbers<[1], [0], [0], [1], [0, 0, 1, 1], [], []>} : vector<8x64xf32>, vector<64x64xf32>, vector<8x64xf32> -> vector<8x64xf32>
    %c0_40 = arith.constant 0 : index
    %c0_41 = arith.constant 0 : index
    %97 = vector.load %arg8[%c0_40, %c0_41] : memref<1x64xf32, #tpu.memory_space<vmem>>, vector<1x64xf32>
    %98 = vector.broadcast %97 : vector<1x64xf32> to vector<8x64xf32>
    %99 = arith.addf %96, %98 : vector<8x64xf32>
    %100 = vector.broadcast %92 : vector<8x1xf32> to vector<8x64xf32>
    %101 = arith.mulf %99, %100 : vector<8x64xf32>
    %102 = arith.subf %99, %101 : vector<8x64xf32>
    %cst_42 = arith.constant dense<0.000000e+00> : vector<64xf32>
    %103 = vector.multi_reduction <add>, %101, %cst_42 [0] : vector<8x64xf32> to vector<64xf32>
    %104 = vector.shape_cast %103 : vector<64xf32> to vector<1x64xf32>
    %cst_43 = arith.constant 2.500000e-01 : f32
    %105 = vector.broadcast %cst_43 : f32 to vector<1x64xf32>
    %106 = arith.mulf %104, %105 : vector<1x64xf32>
    %cst_44 = arith.constant dense<0.000000e+00> : vector<64xf32>
    %107 = vector.multi_reduction <add>, %102, %cst_44 [0] : vector<8x64xf32> to vector<64xf32>
    %108 = vector.shape_cast %107 : vector<64xf32> to vector<1x64xf32>
    %cst_45 = arith.constant 2.500000e-01 : f32
    %109 = vector.broadcast %cst_45 : f32 to vector<1x64xf32>
    %110 = arith.mulf %108, %109 : vector<1x64xf32>
    %111 = arith.mulf %101, %99 : vector<8x64xf32>
    %cst_46 = arith.constant dense<0.000000e+00> : vector<64xf32>
    %112 = vector.multi_reduction <add>, %111, %cst_46 [0] : vector<8x64xf32> to vector<64xf32>
    %113 = vector.shape_cast %112 : vector<64xf32> to vector<1x64xf32>
    %cst_47 = arith.constant 2.500000e-01 : f32
    %114 = vector.broadcast %cst_47 : f32 to vector<1x64xf32>
    %115 = arith.mulf %113, %114 : vector<1x64xf32>
    %116 = arith.mulf %102, %99 : vector<8x64xf32>
    %cst_48 = arith.constant dense<0.000000e+00> : vector<64xf32>
    %117 = vector.multi_reduction <add>, %116, %cst_48 [0] : vector<8x64xf32> to vector<64xf32>
    %118 = vector.shape_cast %117 : vector<64xf32> to vector<1x64xf32>
    %cst_49 = arith.constant 2.500000e-01 : f32
    %119 = vector.broadcast %cst_49 : f32 to vector<1x64xf32>
    %120 = arith.mulf %118, %119 : vector<1x64xf32>
    %121 = vector.broadcast %92 : vector<8x1xf32> to vector<8x64xf32>
    %122 = vector.broadcast %106 : vector<1x64xf32> to vector<8x64xf32>
    %123 = arith.mulf %121, %122 : vector<8x64xf32>
    %124 = vector.broadcast %94 : vector<8x1xf32> to vector<8x64xf32>
    %125 = vector.broadcast %110 : vector<1x64xf32> to vector<8x64xf32>
    %126 = arith.mulf %124, %125 : vector<8x64xf32>
    %127 = arith.addf %123, %126 : vector<8x64xf32>
    %128 = arith.mulf %106, %106 : vector<1x64xf32>
    %129 = arith.subf %115, %128 : vector<1x64xf32>
    %cst_50 = arith.constant 0.000000e+00 : f32
    %130 = vector.broadcast %cst_50 : f32 to vector<1x64xf32>
    %131 = arith.maximumf %129, %130 : vector<1x64xf32>
    %132 = vector.broadcast %92 : vector<8x1xf32> to vector<8x64xf32>
    %133 = vector.broadcast %131 : vector<1x64xf32> to vector<8x64xf32>
    %134 = arith.mulf %132, %133 : vector<8x64xf32>
    %135 = arith.mulf %110, %110 : vector<1x64xf32>
    %136 = arith.subf %120, %135 : vector<1x64xf32>
    %cst_51 = arith.constant 0.000000e+00 : f32
    %137 = vector.broadcast %cst_51 : f32 to vector<1x64xf32>
    %138 = arith.maximumf %136, %137 : vector<1x64xf32>
    %139 = vector.broadcast %94 : vector<8x1xf32> to vector<8x64xf32>
    %140 = vector.broadcast %138 : vector<1x64xf32> to vector<8x64xf32>
    %141 = arith.mulf %139, %140 : vector<8x64xf32>
    %142 = arith.addf %134, %141 : vector<8x64xf32>
    %143 = arith.subf %99, %127 : vector<8x64xf32>
    %cst_52 = arith.constant 9.99999974E-6 : f32
    %144 = vector.broadcast %cst_52 : f32 to vector<8x64xf32>
    %145 = arith.addf %142, %144 : vector<8x64xf32>
    %146 = math.rsqrt %145 : vector<8x64xf32>
    %147 = arith.mulf %143, %146 : vector<8x64xf32>
    %cst_53 = arith.constant 0.000000e+00 : f32
    %148 = vector.broadcast %cst_53 : f32 to vector<8x64xf32>
    %149 = arith.maximumf %147, %148 : vector<8x64xf32>
    %c0_54 = arith.constant 0 : index
    %c0_55 = arith.constant 0 : index
    %150 = vector.load %arg9[%c0_54, %c0_55] : memref<64x64xf32, #tpu.memory_space<vmem>>, vector<64x64xf32>
    %cst_56 = arith.constant dense<0.000000e+00> : vector<8x64xf32>
    %151 = tpu.matmul %149, %150, %cst_56 {dimension_numbers = #tpu.dot_dimension_numbers<[1], [0], [0], [1], [0, 0, 1, 1], [], []>} : vector<8x64xf32>, vector<64x64xf32>, vector<8x64xf32> -> vector<8x64xf32>
    %c0_57 = arith.constant 0 : index
    %c0_58 = arith.constant 0 : index
    %152 = vector.load %arg10[%c0_57, %c0_58] : memref<1x64xf32, #tpu.memory_space<vmem>>, vector<1x64xf32>
    %153 = vector.broadcast %152 : vector<1x64xf32> to vector<8x64xf32>
    %154 = arith.addf %151, %153 : vector<8x64xf32>
    %155 = vector.broadcast %92 : vector<8x1xf32> to vector<8x64xf32>
    %156 = arith.mulf %154, %155 : vector<8x64xf32>
    %157 = arith.subf %154, %156 : vector<8x64xf32>
    %cst_59 = arith.constant dense<0.000000e+00> : vector<64xf32>
    %158 = vector.multi_reduction <add>, %156, %cst_59 [0] : vector<8x64xf32> to vector<64xf32>
    %159 = vector.shape_cast %158 : vector<64xf32> to vector<1x64xf32>
    %cst_60 = arith.constant 2.500000e-01 : f32
    %160 = vector.broadcast %cst_60 : f32 to vector<1x64xf32>
    %161 = arith.mulf %159, %160 : vector<1x64xf32>
    %cst_61 = arith.constant dense<0.000000e+00> : vector<64xf32>
    %162 = vector.multi_reduction <add>, %157, %cst_61 [0] : vector<8x64xf32> to vector<64xf32>
    %163 = vector.shape_cast %162 : vector<64xf32> to vector<1x64xf32>
    %cst_62 = arith.constant 2.500000e-01 : f32
    %164 = vector.broadcast %cst_62 : f32 to vector<1x64xf32>
    %165 = arith.mulf %163, %164 : vector<1x64xf32>
    %166 = arith.mulf %156, %154 : vector<8x64xf32>
    %cst_63 = arith.constant dense<0.000000e+00> : vector<64xf32>
    %167 = vector.multi_reduction <add>, %166, %cst_63 [0] : vector<8x64xf32> to vector<64xf32>
    %168 = vector.shape_cast %167 : vector<64xf32> to vector<1x64xf32>
    %cst_64 = arith.constant 2.500000e-01 : f32
    %169 = vector.broadcast %cst_64 : f32 to vector<1x64xf32>
    %170 = arith.mulf %168, %169 : vector<1x64xf32>
    %171 = arith.mulf %157, %154 : vector<8x64xf32>
    %cst_65 = arith.constant dense<0.000000e+00> : vector<64xf32>
    %172 = vector.multi_reduction <add>, %171, %cst_65 [0] : vector<8x64xf32> to vector<64xf32>
    %173 = vector.shape_cast %172 : vector<64xf32> to vector<1x64xf32>
    %cst_66 = arith.constant 2.500000e-01 : f32
    %174 = vector.broadcast %cst_66 : f32 to vector<1x64xf32>
    %175 = arith.mulf %173, %174 : vector<1x64xf32>
    %176 = vector.broadcast %92 : vector<8x1xf32> to vector<8x64xf32>
    %177 = vector.broadcast %161 : vector<1x64xf32> to vector<8x64xf32>
    %178 = arith.mulf %176, %177 : vector<8x64xf32>
    %179 = vector.broadcast %94 : vector<8x1xf32> to vector<8x64xf32>
    %180 = vector.broadcast %165 : vector<1x64xf32> to vector<8x64xf32>
    %181 = arith.mulf %179, %180 : vector<8x64xf32>
    %182 = arith.addf %178, %181 : vector<8x64xf32>
    %183 = arith.mulf %161, %161 : vector<1x64xf32>
    %184 = arith.subf %170, %183 : vector<1x64xf32>
    %cst_67 = arith.constant 0.000000e+00 : f32
    %185 = vector.broadcast %cst_67 : f32 to vector<1x64xf32>
    %186 = arith.maximumf %184, %185 : vector<1x64xf32>
    %187 = vector.broadcast %92 : vector<8x1xf32> to vector<8x64xf32>
    %188 = vector.broadcast %186 : vector<1x64xf32> to vector<8x64xf32>
    %189 = arith.mulf %187, %188 : vector<8x64xf32>
    %190 = arith.mulf %165, %165 : vector<1x64xf32>
    %191 = arith.subf %175, %190 : vector<1x64xf32>
    %cst_68 = arith.constant 0.000000e+00 : f32
    %192 = vector.broadcast %cst_68 : f32 to vector<1x64xf32>
    %193 = arith.maximumf %191, %192 : vector<1x64xf32>
    %194 = vector.broadcast %94 : vector<8x1xf32> to vector<8x64xf32>
    %195 = vector.broadcast %193 : vector<1x64xf32> to vector<8x64xf32>
    %196 = arith.mulf %194, %195 : vector<8x64xf32>
    %197 = arith.addf %189, %196 : vector<8x64xf32>
    %198 = arith.subf %154, %182 : vector<8x64xf32>
    %cst_69 = arith.constant 9.99999974E-6 : f32
    %199 = vector.broadcast %cst_69 : f32 to vector<8x64xf32>
    %200 = arith.addf %197, %199 : vector<8x64xf32>
    %201 = math.rsqrt %200 : vector<8x64xf32>
    %202 = arith.mulf %198, %201 : vector<8x64xf32>
    %cst_70 = arith.constant 0.000000e+00 : f32
    %203 = vector.broadcast %cst_70 : f32 to vector<8x64xf32>
    %204 = arith.maximumf %202, %203 : vector<8x64xf32>
    %c0_71 = arith.constant 0 : index
    %c0_72 = arith.constant 0 : index
    %205 = vector.load %arg11[%c0_71, %c0_72] : memref<64x64xf32, #tpu.memory_space<vmem>>, vector<64x64xf32>
    %cst_73 = arith.constant dense<0.000000e+00> : vector<8x64xf32>
    %206 = tpu.matmul %204, %205, %cst_73 {dimension_numbers = #tpu.dot_dimension_numbers<[1], [0], [0], [1], [0, 0, 1, 1], [], []>} : vector<8x64xf32>, vector<64x64xf32>, vector<8x64xf32> -> vector<8x64xf32>
    %c0_74 = arith.constant 0 : index
    %c0_75 = arith.constant 0 : index
    %207 = vector.load %arg12[%c0_74, %c0_75] : memref<1x64xf32, #tpu.memory_space<vmem>>, vector<1x64xf32>
    %208 = vector.broadcast %207 : vector<1x64xf32> to vector<8x64xf32>
    %209 = arith.addf %206, %208 : vector<8x64xf32>
    %210 = vector.broadcast %92 : vector<8x1xf32> to vector<8x64xf32>
    %211 = arith.mulf %209, %210 : vector<8x64xf32>
    %212 = arith.subf %209, %211 : vector<8x64xf32>
    %cst_76 = arith.constant dense<0.000000e+00> : vector<64xf32>
    %213 = vector.multi_reduction <add>, %211, %cst_76 [0] : vector<8x64xf32> to vector<64xf32>
    %214 = vector.shape_cast %213 : vector<64xf32> to vector<1x64xf32>
    %cst_77 = arith.constant 2.500000e-01 : f32
    %215 = vector.broadcast %cst_77 : f32 to vector<1x64xf32>
    %216 = arith.mulf %214, %215 : vector<1x64xf32>
    %cst_78 = arith.constant dense<0.000000e+00> : vector<64xf32>
    %217 = vector.multi_reduction <add>, %212, %cst_78 [0] : vector<8x64xf32> to vector<64xf32>
    %218 = vector.shape_cast %217 : vector<64xf32> to vector<1x64xf32>
    %cst_79 = arith.constant 2.500000e-01 : f32
    %219 = vector.broadcast %cst_79 : f32 to vector<1x64xf32>
    %220 = arith.mulf %218, %219 : vector<1x64xf32>
    %221 = arith.mulf %211, %209 : vector<8x64xf32>
    %cst_80 = arith.constant dense<0.000000e+00> : vector<64xf32>
    %222 = vector.multi_reduction <add>, %221, %cst_80 [0] : vector<8x64xf32> to vector<64xf32>
    %223 = vector.shape_cast %222 : vector<64xf32> to vector<1x64xf32>
    %cst_81 = arith.constant 2.500000e-01 : f32
    %224 = vector.broadcast %cst_81 : f32 to vector<1x64xf32>
    %225 = arith.mulf %223, %224 : vector<1x64xf32>
    %226 = arith.mulf %212, %209 : vector<8x64xf32>
    %cst_82 = arith.constant dense<0.000000e+00> : vector<64xf32>
    %227 = vector.multi_reduction <add>, %226, %cst_82 [0] : vector<8x64xf32> to vector<64xf32>
    %228 = vector.shape_cast %227 : vector<64xf32> to vector<1x64xf32>
    %cst_83 = arith.constant 2.500000e-01 : f32
    %229 = vector.broadcast %cst_83 : f32 to vector<1x64xf32>
    %230 = arith.mulf %228, %229 : vector<1x64xf32>
    %231 = vector.broadcast %92 : vector<8x1xf32> to vector<8x64xf32>
    %232 = vector.broadcast %216 : vector<1x64xf32> to vector<8x64xf32>
    %233 = arith.mulf %231, %232 : vector<8x64xf32>
    %234 = vector.broadcast %94 : vector<8x1xf32> to vector<8x64xf32>
    %235 = vector.broadcast %220 : vector<1x64xf32> to vector<8x64xf32>
    %236 = arith.mulf %234, %235 : vector<8x64xf32>
    %237 = arith.addf %233, %236 : vector<8x64xf32>
    %238 = arith.mulf %216, %216 : vector<1x64xf32>
    %239 = arith.subf %225, %238 : vector<1x64xf32>
    %cst_84 = arith.constant 0.000000e+00 : f32
    %240 = vector.broadcast %cst_84 : f32 to vector<1x64xf32>
    %241 = arith.maximumf %239, %240 : vector<1x64xf32>
    %242 = vector.broadcast %92 : vector<8x1xf32> to vector<8x64xf32>
    %243 = vector.broadcast %241 : vector<1x64xf32> to vector<8x64xf32>
    %244 = arith.mulf %242, %243 : vector<8x64xf32>
    %245 = arith.mulf %220, %220 : vector<1x64xf32>
    %246 = arith.subf %230, %245 : vector<1x64xf32>
    %cst_85 = arith.constant 0.000000e+00 : f32
    %247 = vector.broadcast %cst_85 : f32 to vector<1x64xf32>
    %248 = arith.maximumf %246, %247 : vector<1x64xf32>
    %249 = vector.broadcast %94 : vector<8x1xf32> to vector<8x64xf32>
    %250 = vector.broadcast %248 : vector<1x64xf32> to vector<8x64xf32>
    %251 = arith.mulf %249, %250 : vector<8x64xf32>
    %252 = arith.addf %244, %251 : vector<8x64xf32>
    %253 = arith.subf %209, %237 : vector<8x64xf32>
    %cst_86 = arith.constant 9.99999974E-6 : f32
    %254 = vector.broadcast %cst_86 : f32 to vector<8x64xf32>
    %255 = arith.addf %252, %254 : vector<8x64xf32>
    %256 = math.rsqrt %255 : vector<8x64xf32>
    %257 = arith.mulf %253, %256 : vector<8x64xf32>
    %c0_87 = arith.constant 0 : index
    %c0_88 = arith.constant 0 : index
    %258 = vector.load %arg13[%c0_87, %c0_88] : memref<64x32xf32, #tpu.memory_space<vmem>>, vector<64x32xf32>
    %cst_89 = arith.constant dense<0.000000e+00> : vector<8x32xf32>
    %259 = tpu.matmul %257, %258, %cst_89 {dimension_numbers = #tpu.dot_dimension_numbers<[1], [0], [0], [1], [0, 0, 1, 1], [], []>} : vector<8x64xf32>, vector<64x32xf32>, vector<8x32xf32> -> vector<8x32xf32>
    %c0_90 = arith.constant 0 : index
    %c0_91 = arith.constant 0 : index
    %260 = vector.load %arg14[%c0_90, %c0_91] : memref<1x32xf32, #tpu.memory_space<vmem>>, vector<1x32xf32>
    %261 = vector.broadcast %260 : vector<1x32xf32> to vector<8x32xf32>
    %262 = arith.addf %259, %261 : vector<8x32xf32>
    %263 = vector.broadcast %92 : vector<8x1xf32> to vector<8x32xf32>
    %264 = arith.mulf %262, %263 : vector<8x32xf32>
    %265 = arith.subf %262, %264 : vector<8x32xf32>
    %cst_92 = arith.constant dense<0.000000e+00> : vector<32xf32>
    %266 = vector.multi_reduction <add>, %264, %cst_92 [0] : vector<8x32xf32> to vector<32xf32>
    %267 = vector.shape_cast %266 : vector<32xf32> to vector<1x32xf32>
    %cst_93 = arith.constant 2.500000e-01 : f32
    %268 = vector.broadcast %cst_93 : f32 to vector<1x32xf32>
    %269 = arith.mulf %267, %268 : vector<1x32xf32>
    %cst_94 = arith.constant dense<0.000000e+00> : vector<32xf32>
    %270 = vector.multi_reduction <add>, %265, %cst_94 [0] : vector<8x32xf32> to vector<32xf32>
    %271 = vector.shape_cast %270 : vector<32xf32> to vector<1x32xf32>
    %cst_95 = arith.constant 2.500000e-01 : f32
    %272 = vector.broadcast %cst_95 : f32 to vector<1x32xf32>
    %273 = arith.mulf %271, %272 : vector<1x32xf32>
    %274 = arith.mulf %264, %262 : vector<8x32xf32>
    %cst_96 = arith.constant dense<0.000000e+00> : vector<32xf32>
    %275 = vector.multi_reduction <add>, %274, %cst_96 [0] : vector<8x32xf32> to vector<32xf32>
    %276 = vector.shape_cast %275 : vector<32xf32> to vector<1x32xf32>
    %cst_97 = arith.constant 2.500000e-01 : f32
    %277 = vector.broadcast %cst_97 : f32 to vector<1x32xf32>
    %278 = arith.mulf %276, %277 : vector<1x32xf32>
    %279 = arith.mulf %265, %262 : vector<8x32xf32>
    %cst_98 = arith.constant dense<0.000000e+00> : vector<32xf32>
    %280 = vector.multi_reduction <add>, %279, %cst_98 [0] : vector<8x32xf32> to vector<32xf32>
    %281 = vector.shape_cast %280 : vector<32xf32> to vector<1x32xf32>
    %cst_99 = arith.constant 2.500000e-01 : f32
    %282 = vector.broadcast %cst_99 : f32 to vector<1x32xf32>
    %283 = arith.mulf %281, %282 : vector<1x32xf32>
    %284 = vector.broadcast %92 : vector<8x1xf32> to vector<8x32xf32>
    %285 = vector.broadcast %269 : vector<1x32xf32> to vector<8x32xf32>
    %286 = arith.mulf %284, %285 : vector<8x32xf32>
    %287 = vector.broadcast %94 : vector<8x1xf32> to vector<8x32xf32>
    %288 = vector.broadcast %273 : vector<1x32xf32> to vector<8x32xf32>
    %289 = arith.mulf %287, %288 : vector<8x32xf32>
    %290 = arith.addf %286, %289 : vector<8x32xf32>
    %291 = arith.mulf %269, %269 : vector<1x32xf32>
    %292 = arith.subf %278, %291 : vector<1x32xf32>
    %cst_100 = arith.constant 0.000000e+00 : f32
    %293 = vector.broadcast %cst_100 : f32 to vector<1x32xf32>
    %294 = arith.maximumf %292, %293 : vector<1x32xf32>
    %295 = vector.broadcast %92 : vector<8x1xf32> to vector<8x32xf32>
    %296 = vector.broadcast %294 : vector<1x32xf32> to vector<8x32xf32>
    %297 = arith.mulf %295, %296 : vector<8x32xf32>
    %298 = arith.mulf %273, %273 : vector<1x32xf32>
    %299 = arith.subf %283, %298 : vector<1x32xf32>
    %cst_101 = arith.constant 0.000000e+00 : f32
    %300 = vector.broadcast %cst_101 : f32 to vector<1x32xf32>
    %301 = arith.maximumf %299, %300 : vector<1x32xf32>
    %302 = vector.broadcast %94 : vector<8x1xf32> to vector<8x32xf32>
    %303 = vector.broadcast %301 : vector<1x32xf32> to vector<8x32xf32>
    %304 = arith.mulf %302, %303 : vector<8x32xf32>
    %305 = arith.addf %297, %304 : vector<8x32xf32>
    %306 = arith.subf %262, %290 : vector<8x32xf32>
    %cst_102 = arith.constant 9.99999974E-6 : f32
    %307 = vector.broadcast %cst_102 : f32 to vector<8x32xf32>
    %308 = arith.addf %305, %307 : vector<8x32xf32>
    %309 = math.rsqrt %308 : vector<8x32xf32>
    %310 = arith.mulf %306, %309 : vector<8x32xf32>
    %cst_103 = arith.constant 0.000000e+00 : f32
    %311 = vector.broadcast %cst_103 : f32 to vector<8x32xf32>
    %312 = arith.maximumf %310, %311 : vector<8x32xf32>
    %c0_104 = arith.constant 0 : index
    %c0_105 = arith.constant 0 : index
    %313 = vector.load %arg15[%c0_104, %c0_105] : memref<32x64xf32, #tpu.memory_space<vmem>>, vector<32x64xf32>
    %cst_106 = arith.constant dense<0.000000e+00> : vector<8x64xf32>
    %314 = tpu.matmul %312, %313, %cst_106 {dimension_numbers = #tpu.dot_dimension_numbers<[1], [0], [0], [1], [0, 0, 1, 1], [], []>} : vector<8x32xf32>, vector<32x64xf32>, vector<8x64xf32> -> vector<8x64xf32>
    %c0_107 = arith.constant 0 : index
    %c0_108 = arith.constant 0 : index
    %315 = vector.load %arg16[%c0_107, %c0_108] : memref<1x64xf32, #tpu.memory_space<vmem>>, vector<1x64xf32>
    %316 = vector.broadcast %315 : vector<1x64xf32> to vector<8x64xf32>
    %317 = arith.addf %314, %316 : vector<8x64xf32>
    %c4_i32_109 = arith.constant 4 : i32
    %318 = tpu.dynamic_rotate %257 by %c4_i32_109 dim 0 : vector<8x64xf32>, i32 -> vector<8x64xf32>
    %319 = arith.mulf %317, %318 : vector<8x64xf32>
    %cst_110 = arith.constant dense<0.000000e+00> : vector<8xf32>
    %320 = vector.multi_reduction <add>, %319, %cst_110 [1] : vector<8x64xf32> to vector<8xf32>
    %321 = vector.shape_cast %320 : vector<8xf32> to vector<8x1xf32>
    %322 = arith.mulf %317, %317 : vector<8x64xf32>
    %cst_111 = arith.constant dense<0.000000e+00> : vector<8xf32>
    %323 = vector.multi_reduction <add>, %322, %cst_111 [1] : vector<8x64xf32> to vector<8xf32>
    %324 = vector.shape_cast %323 : vector<8xf32> to vector<8x1xf32>
    %325 = arith.mulf %318, %318 : vector<8x64xf32>
    %cst_112 = arith.constant dense<0.000000e+00> : vector<8xf32>
    %326 = vector.multi_reduction <add>, %325, %cst_112 [1] : vector<8x64xf32> to vector<8xf32>
    %327 = vector.shape_cast %326 : vector<8xf32> to vector<8x1xf32>
    %328 = arith.mulf %324, %327 : vector<8x1xf32>
    %cst_113 = arith.constant 1.000000e-16 : f32
    %329 = vector.broadcast %cst_113 : f32 to vector<8x1xf32>
    %330 = arith.maximumf %328, %329 : vector<8x1xf32>
    %331 = math.rsqrt %330 : vector<8x1xf32>
    %332 = arith.mulf %321, %331 : vector<8x1xf32>
    %cst_114 = arith.constant dense<0.000000e+00> : vector<1xf32>
    %333 = vector.multi_reduction <add>, %332, %cst_114 [0] : vector<8x1xf32> to vector<1xf32>
    %334 = vector.shape_cast %333 : vector<1xf32> to vector<1x1xf32>
    %cst_115 = arith.constant 0.000000e+00 : f32
    %335 = vector.broadcast %cst_115 : f32 to vector<1x1xf32>
    %336 = arith.subf %335, %334 : vector<1x1xf32>
    %cst_116 = arith.constant 1.250000e-01 : f32
    %337 = vector.broadcast %cst_116 : f32 to vector<1x1xf32>
    %338 = arith.mulf %336, %337 : vector<1x1xf32>
    %c0_117 = arith.constant 0 : index
    %c0_118 = arith.constant 0 : index
    %339 = vector.load %arg17[%c0_117, %c0_118] : memref<1x1xf32, #tpu.memory_space<vmem>>, vector<1x1xf32>
    tpu.vector_store %arg17[%c0_117, %c0_118], %338 {strides = array<i32>} : memref<1x1xf32, #tpu.memory_space<vmem>>, vector<1x1xf32>,
    return
  }
}

</mosaic_0001>

<bundles_post_ra>
// kernel: tpu_custom_call.1
= control target key start
LH: loop header
LB: loop body
LE: loop exit
PB: predicated region body
PF: predicated region fallthrough
CT: control target
= control target key end

     0   :  { %s3568_s0 = inlined_call_operand.vmem [shape: f32[128,8], index: 0, kind: input, shape index: {}]   ;;  %s3569_s1 = inlined_call_operand.hbm [shape: f32[8,16], index: 1, kind: input, shape index: {}]   ;;  %s3570_s2 = inlined_call_operand.vmem [shape: f32[1,16], index: 2, kind: input, shape index: {}]   ;;  %s3571_s3 = inlined_call_operand.hbm [shape: f32[16,32], index: 3, kind: input, shape index: {}]   ;;  %s3572_s4 = inlined_call_operand.hbm [shape: f32[1,32], index: 4, kind: input, shape index: {}]   ;;  %s3573_s5 = inlined_call_operand.vmem [shape: f32[32,64], index: 5, kind: input, shape index: {}]   ;;  %s3574_s6 = inlined_call_operand.hbm [shape: f32[1,64], index: 6, kind: input, shape index: {}]   ;;  %s3575_s7 = inlined_call_operand.vmem [shape: f32[64,64], index: 7, kind: input, shape index: {}]   ;;  %s3576_s8 = inlined_call_operand.hbm [shape: f32[1,64], index: 8, kind: input, shape index: {}]   ;;  %s3577_s9 = inlined_call_operand.vmem [shape: f32[64,64], index: 9, kind: input, shape index: {}]   ;;  %s3578_s10 = inlined_call_operand.hbm [shape: f32[1,64], index: 10, kind: input, shape index: {}]   ;;  %s3579_s11 = inlined_call_operand.vmem [shape: f32[64,64], index: 11, kind: input, shape index: {}]   ;;  %s3580_s12 = inlined_call_operand.hbm [shape: f32[1,64], index: 12, kind: input, shape index: {}]   ;;  %s3581_s13 = inlined_call_operand.vmem [shape: f32[64,32], index: 13, kind: input, shape index: {}]   ;;  %s3582_s14 = inlined_call_operand.hbm [shape: f32[1,32], index: 14, kind: input, shape index: {}]   ;;  %s3583_s15 = inlined_call_operand.vmem [shape: f32[32,64], index: 15, kind: input, shape index: {}]   ;;  %s3584_s16 = inlined_call_operand.vmem [shape: f32[1,64], index: 16, kind: input, shape index: {}]   ;;  %s3585_s17 = inlined_call_operand.hbm [shape: f32[1,1], index: 17, kind: output, shape index: {}]  }
   0x1   :  { %3587 = sst [smem:[#allocation23_spill]] %s3568_s0 }
   0x2   :  { %3588 = sst [smem:[#allocation24_spill]] %s3569_s1 }
   0x3   :  { %22 = vsyncpa [#allocation3], 0 }
   0x4   :  { %23 = vsyncpa [#allocation6], 0 }
   0x5   :  { %24 = vsyncpa [#allocation9], 0 }
   0x6   :  { %25 = vsyncpa [#allocation12], 0 }
   0x7   :  { %26 = vsyncpa [#allocation15], 0 }
   0x8   :  { %27 = vsyncpa [#allocation4], 0  ;;  %s2602_s24 = smov [#allocation5]  }
   0x9   :  { %s47_s25 = sshll.u32 %s2602_s24, 4  ;;  %s48_s25 = int_to_ptr.vmem [resolvable:$true] %s47_s25 }
   0xa   :  { %s2418_s26 = scalar_lea.vmem %s48_s25, 256  ;;  %p2423_p1 = scmp.lt.s32.totalorder %s48_s25, %s48_s25 }
   0xb   :  { %p2419_p0 = scmp.ne.s32.totalorder %s48_s25, %s2418_s26  ;;  %p2424_p2 = scmp.lt.s32.totalorder %s2418_s26, %s2418_s26 }
   0xd   :  { %p2425_p3 = por %p2424_p2, %p2423_p1 }
   0xf   :  { %p2426_p4 = pnand %p2425_p3, %p2419_p0 }
  0x11   :  { %2429 = shalt.err (!%p2426_p4)
}
  0x12   :  { %s2603_s27 = smov 128   ;;  %s2604_s28 = smov 8  }
  0x13   :  { %53 = dma.hbm_to_vmem [thread:$0]  %s3571_s3, 256, %s48_s25, [#allocation6], %s2603_s27, %s2603_s27, %s2604_s28  }
  0x14   :  { %s2605_s30 = smov [#allocation8]   ;;  %s2606_s19 = smov [#allocation11]  }
  0x15   :  { %s72_s18 = sshll.u32 %s2605_s30, 4  ;;  %s96_s1 = sshll.u32 %s2606_s19, 4  ;;  %s73_s18 = int_to_ptr.vmem [resolvable:$true] %s72_s18  ;;  %s97_s1 = int_to_ptr.vmem [resolvable:$true] %s96_s1 }
  0x16   :  { %s2438_s20 = scalar_lea.vmem %s73_s18, 16  ;;  %s2442_s21 = scalar_lea.vmem %s73_s18, 32 }
  0x17   :  { %p2439_p5 = scmp.ne.s32.totalorder %s73_s18, %s2438_s20  ;;  %p2443_p6 = scmp.lt.s32.totalorder %s73_s18, %s73_s18 }
  0x18   :  { %p2444_p7 = scmp.lt.s32.totalorder %s2442_s21, %s2438_s20 }
  0x1a   :  { %p2445_p8 = por %p2444_p7, %p2443_p6 }
  0x1c   :  { %p2446_p9 = pnand %p2445_p8, %p2439_p5 }
  0x1e   :  { %2449 = shalt.err (!%p2446_p9)
}
  0x1f   :  { %75 = dma.hbm_to_vmem [thread:$0]  %s3574_s6, 16, %s73_s18, [#allocation9]  }
  0x20   :  { %s2458_s24 = scalar_lea.vmem %s97_s1, 16  ;;  %s2462_s3 = scalar_lea.vmem %s97_s1, 32 }
  0x21   :  { %p2459_p10 = scmp.ne.s32.totalorder %s97_s1, %s2458_s24  ;;  %p2463_p11 = scmp.lt.s32.totalorder %s97_s1, %s97_s1 }
  0x22   :  { %p2464_p12 = scmp.lt.s32.totalorder %s2462_s3, %s2458_s24 }
  0x24   :  { %p2465_p13 = por %p2464_p12, %p2463_p11 }
  0x26   :  { %p2466_p0 = pnand %p2465_p13, %p2459_p10 }
  0x28   :  { %2469 = shalt.err (!%p2466_p0)
}
  0x29   :  { %99 = dma.hbm_to_vmem [thread:$0]  %s3578_s10, 16, %s97_s1, [#allocation12]  }
  0x2a   :  { %s2607_s27 = smov [#allocation2]   ;;  %s2608_s29 = smov [#allocation7]  }
  0x2b   :  { %s36_s28 = sshll.u32 %s2607_s27, 4  ;;  %s60_s0 = sshll.u32 %s2608_s29, 4  ;;  %s37_s28 = int_to_ptr.vmem [resolvable:$true] %s36_s28  ;;  %s61_s0 = int_to_ptr.vmem [resolvable:$true] %s60_s0 }
  0x2c   :  { %s2478_s30 = scalar_lea.vmem %s37_s28, 128  ;;  %p2483_p2 = scmp.lt.s32.totalorder %s37_s28, %s37_s28 }
  0x2d   :  { %p2479_p1 = scmp.ne.s32.totalorder %s37_s28, %s2478_s30  ;;  %p2484_p3 = scmp.lt.s32.totalorder %s2478_s30, %s2478_s30 }
  0x2f   :  { %p2485_p4 = por %p2484_p3, %p2483_p2 }
  0x31   :  { %p2486_p5 = pnand %p2485_p4, %p2479_p1 }
  0x33   :  { %2489 = shalt.err (!%p2486_p5)
}
  0x34   :  { %s3589_s19 = sld [smem:[#allocation24_spill]]  ;;  %s2498_s20 = scalar_lea.vmem %s61_s0, 16 }
  0x35   :  { %p2499_p6 = scmp.ne.s32.totalorder %s61_s0, %s2498_s20  ;;  %s2502_s10 = scalar_lea.vmem %s61_s0, 32 }
  0x36   :  { %p2503_p7 = scmp.lt.s32.totalorder %s61_s0, %s61_s0  ;;  %p2504_p8 = scmp.lt.s32.totalorder %s2502_s10, %s2498_s20 }
  0x38   :  { %p2505_p9 = por %p2504_p8, %p2503_p7 }
  0x3a   :  { %39 = dma.hbm_to_vmem [thread:$0]  %s3589_s19, 128, %s37_s28, [#allocation3]  }
  0x3b   :  { %p2506_p10 = pnand %p2505_p9, %p2499_p6 }
  0x3d   :  { %2509 = shalt.err (!%p2506_p10)
}
  0x3e   :  { %63 = dma.hbm_to_vmem [thread:$0]  %s3572_s4, 16, %s61_s0, [#allocation6]  }
  0x3f   :  { %s2609_s22 = smov [#allocation10]   ;;  %s2610_s24 = smov [#allocation13]  }
  0x40   :  { %s84_s23 = sshll.u32 %s2609_s22, 4  ;;  %s108_s3 = sshll.u32 %s2610_s24, 4  ;;  %s85_s23 = int_to_ptr.vmem [resolvable:$true] %s84_s23  ;;  %s109_s3 = int_to_ptr.vmem [resolvable:$true] %s108_s3 }
  0x41   :  { %s2518_s25 = scalar_lea.vmem %s85_s23, 16  ;;  %s2522_s26 = scalar_lea.vmem %s85_s23, 32 }
  0x42   :  { %p2519_p11 = scmp.ne.s32.totalorder %s85_s23, %s2518_s25  ;;  %p2523_p12 = scmp.lt.s32.totalorder %s85_s23, %s85_s23 }
  0x43   :  { %p2524_p13 = scmp.lt.s32.totalorder %s2522_s26, %s2518_s25 }
  0x45   :  { %p2525_p0 = por %p2524_p13, %p2523_p12 }
  0x47   :  { %p2526_p1 = pnand %p2525_p0, %p2519_p11 }
  0x49   :  { %2529 = shalt.err (!%p2526_p1)
}
  0x4a   :  { %87 = dma.hbm_to_vmem [thread:$0]  %s3576_s8, 16, %s85_s23, [#allocation9]  }
  0x4b   :  { %s2538_s29 = scalar_lea.vmem %s109_s3, 16  ;;  %s2542_s4 = scalar_lea.vmem %s109_s3, 32 }
  0x4c   :  { %p2539_p2 = scmp.ne.s32.totalorder %s109_s3, %s2538_s29  ;;  %p2543_p3 = scmp.lt.s32.totalorder %s109_s3, %s109_s3 }
  0x4d   :  { %p2544_p4 = scmp.lt.s32.totalorder %s2542_s4, %s2538_s29 }
  0x4f   :  { %p2545_p5 = por %p2544_p4, %p2543_p3 }
  0x51   :  { %p2546_p6 = pnand %p2545_p5, %p2539_p2 }
  0x53   :  { %2549 = shalt.err (!%p2546_p6)
}
  0x54   :  { %111 = dma.hbm_to_vmem [thread:$0]  %s3580_s12, 16, %s109_s3, [#allocation12]  }
  0x55   :  { %s2611_s6 = smov [#allocation14]  }
  0x56   :  { %s120_s18 = sshll.u32 %s2611_s6, 4  ;;  %s121_s18 = int_to_ptr.vmem [resolvable:$true] %s120_s18 }
  0x57   :  { %s2558_s19 = scalar_lea.vmem %s121_s18, 16  ;;  %s2562_s20 = scalar_lea.vmem %s121_s18, 32 }
  0x58   :  { %p2559_p7 = scmp.ne.s32.totalorder %s121_s18, %s2558_s19  ;;  %p2563_p8 = scmp.lt.s32.totalorder %s121_s18, %s121_s18 }
  0x59   :  { %p2564_p9 = scmp.lt.s32.totalorder %s2562_s20, %s2558_s19 }
  0x5b   :  { %p2565_p10 = por %p2564_p9, %p2563_p8 }
  0x5d   :  { %p2566_p11 = pnand %p2565_p10, %p2559_p7 }
  0x5f   :  { %2569 = shalt.err (!%p2566_p11)
}
  0x60   :  { %123 = dma.hbm_to_vmem [thread:$0]  %s3582_s14, 16, %s121_s18, [#allocation15]  }
  0x61   :  { %2590 = dma.done.wait [#allocation3], 128  }
  0x62   :  { %2591 = vsyncadd [#allocation3], 4294967168 }
  0x63   :  { %2592 = dma.done.wait [#allocation6], 272  }
  0x64   :  { %2593 = vsyncadd [#allocation6], 4294967024 }
  0x65   :  { %2594 = dma.done.wait [#allocation9], 32  }
  0x66   :  { %2595 = vsyncadd [#allocation9], 4294967264 }
  0x67   :  { %2596 = dma.done.wait [#allocation12], 32  }
  0x68   :  { %2597 = vsyncadd [#allocation12], 4294967264 }
  0x69   :  { %2598 = dma.done.wait [#allocation15], 16  }
  0x6a   :  { %2599 = vsyncadd [#allocation15], 4294967280  ;;  %vm176_vm0 = vcmask 64512   ;;  %v168_v0 = vld [vmem:[#allocation2] sm:$0xff]  ;;  %s3590_s21 = sld [smem:[#allocation23_spill]]  ;;  %v535_v17 = vld [vmem:[#allocation5 + $0x8] sm:$0xff] }
  0x6b   :  { %2200 = vmatprep.subr.mxu0 %v168_v0  ;;  %2373 = vmatprep.subr.mxu1 %v168_v0  ;;  %v534_v18 = vld [vmem:[#allocation5] sm:$0xff]  ;;  %v2796_v19 = vld [vmem:[%s3570_s2] ss:$0 sm:$0xff]  ;;  %vm370_vm1 = vcmask 130048   ;;  %vm736_vm2 = vcmask 261120   ;;  %vm2613_vm3 = vmmov 0  }
  0x6c   :  { %2201 = vmatpush3.msra.mxu0 %v168_v0  ;;  %2374 = vmatpush3.msra.mxu1 %v168_v0  ;;  %vm1103_vm4 = vcmask 523264   ;;  %vm1351_vm5 = vcmask 1041409   ;;  %vm1353_vm6 = vcmask 1042434   ;;  %vm1355_vm7 = vcmask 1043459  }
  0x6d   :  { %2226 = vmatprep.subr.mxu1 %v535_v17  ;;  %vm1357_vm8 = vcmask 1044484   ;;  %vm1359_vm9 = vcmask 1045509   ;;  %vm1361_vm10 = vcmask 1046534   ;;  %vm1363_vm11 = vcmask 1047559  }
  0x6e   :  { %vm2021_vm13 = vcmask 0  }
  0x70   :  { %v152_v1 = vld [vmem:[%s3590_s21] sm:$0xff]  ;;  %v153_v2 = vld [vmem:[%s3590_s21 + $0x8] sm:$0xff]  ;;  %v154_v3 = vld [vmem:[%s3590_s21 + $0x10] sm:$0xff] }
  0x71   :  { %2202 = vmatprep.mubr.msk.f32.mxu0 %vm176_vm0, %v152_v1  ;;  %v155_v4 = vld [vmem:[%s3590_s21 + $0x18] sm:$0xff]  ;;  %v156_v5 = vld [vmem:[%s3590_s21 + $0x20] sm:$0xff]  ;;  %v166_v6 = vld [vmem:[%s3590_s21 + $0x70] sm:$0xff] }
  0x72   :  { %2203 = vmatmul.mubr.msk.f32.vlgmr.msra.gmra.mxu0 %vm176_vm0, %v153_v2  ;;  %v167_v7 = vld [vmem:[%s3590_s21 + $0x78] sm:$0xff]  ;;  %2223 = vmatprep.mubr.msk.f32.mxu1 %vm176_vm0, %v166_v6  ;;  %v157_v8 = vld [vmem:[%s3590_s21 + $0x28] sm:$0xff]  ;;  %v158_v9 = vld [vmem:[%s3590_s21 + $0x30] sm:$0xff] }
  0x73   :  { %2205 = vmatprep.mubr.msk.f32.mxu0 %vm176_vm0, %v154_v3  ;;  %2224 = vmatmul.mubr.msk.f32.vlgmr.msra.gmra.mxu1 %vm176_vm0, %v167_v7  ;;  %v159_v10 = vld [vmem:[%s3590_s21 + $0x38] sm:$0xff]  ;;  %v160_v11 = vld [vmem:[%s3590_s21 + $0x40] sm:$0xff]  ;;  %v161_v12 = vld [vmem:[%s3590_s21 + $0x48] sm:$0xff] }
  0x74   :  { %v162_v13 = vld [vmem:[%s3590_s21 + $0x50] sm:$0xff]  ;;  %v163_v14 = vld [vmem:[%s3590_s21 + $0x58] sm:$0xff]  ;;  %v164_v15 = vld [vmem:[%s3590_s21 + $0x60] sm:$0xff]  ;;  %2227 = vmatpush3.msra.mxu1 %v535_v17 }
  0x75   :  { %v165_v16 = vld [vmem:[%s3590_s21 + $0x68] sm:$0xff]  ;;  %2228 = vmatprep.subr.mxu1 %v534_v18 }
  0x76   :  { %2206 = vmatmul.mubr.msk.f32.gmra.mxu0 %vm176_vm0, %v155_v4  ;;  %2229 = vmatpush3.msra.mxu1 %v534_v18 }
  0x77   :  { %2208 = vmatprep.mubr.msk.f32.mxu0 %vm176_vm0, %v156_v5 }
  0x7a   :  { %2209 = vmatmul.mubr.msk.f32.gmra.mxu0 %vm176_vm0, %v157_v8 }
  0x7b   :  { %2211 = vmatprep.mubr.msk.f32.mxu0 %vm176_vm0, %v158_v9 }
  0x7e   :  { %2212 = vmatmul.mubr.msk.f32.gmra.mxu0 %vm176_vm0, %v159_v10 }
  0x7f   :  { %2214 = vmatprep.mubr.msk.f32.mxu0 %vm176_vm0, %v160_v11 }
  0x82   :  { %2215 = vmatmul.mubr.msk.f32.gmra.mxu0 %vm176_vm0, %v161_v12 }
  0x83   :  { %2217 = vmatprep.mubr.msk.f32.mxu0 %vm176_vm0, %v162_v13 }
  0x86   :  { %2218 = vmatmul.mubr.msk.f32.gmra.mxu0 %vm176_vm0, %v163_v14 }
  0x87   :  { %2220 = vmatprep.mubr.msk.f32.mxu0 %vm176_vm0, %v164_v15 }
  0x8a   :  { %2221 = vmatmul.mubr.msk.f32.gmra.mxu0 %vm176_vm0, %v165_v16 }
 0x132   :  { %v2204_v20 = vpop.f32.mrf.mxu0 }
 0x133   :  { %v2799_v21 = vadd.f32 %v2204_v20, %v2796_v19  ;;  %v2225_v14 = vpop.f32.mrf.mxu1 }
 0x134   :  { %v291_v22 = vpop.f32.mrf.mxu0 }
 0x135   :  { %v2802_v23 = vadd.f32 %v2796_v19, %v291_v22  ;;  %v417_v24 = vmul.f32 %v2799_v21, %v2799_v21  ;;  %v372_v30 = vsel %vm370_vm1, %v2799_v21, 0.0 }
 0x136   :  { %v2207_v25 = vpop.f32.mrf.mxu0 }
 0x137   :  { %v371_v26 = vsel %vm370_vm1, %v2802_v23, 0.0  ;;  %v416_v27 = vmul.f32 %v2802_v23, %v2802_v23  ;;  %v2811_v28 = vadd.f32 %v2207_v25, %v2796_v19  ;;  %v433_v33 = vsel %vm370_vm1, %v417_v24, 0.0 }
 0x138   :  { %v301_v29 = vpop.f32.mrf.mxu0  ;;  %v373_v34 = vadd.f32 %v372_v30, %v371_v26 }
 0x139   :  { %v432_v31 = vsel %vm370_vm1, %v416_v27, 0.0  ;;  %v2817_v32 = vadd.f32 %v2796_v19, %v301_v29  ;;  %v419_v36 = vmul.f32 %v2811_v28, %v2811_v28  ;;  %v376_v43 = vsel %vm370_vm1, %v2811_v28, 0.0 }
 0x13a   :  { %v2210_v35 = vpop.f32.mrf.mxu0  ;;  %v434_v40 = vadd.f32 %v433_v33, %v432_v31  ;;  %v2884_v29 = vadd.f32 %v2225_v14, %v2796_v19 }
 0x13b   :  { %v374_v37 = vsel %vm370_vm1, %v2817_v32, 0.0  ;;  %v418_v38 = vmul.f32 %v2817_v32, %v2817_v32  ;;  %v2827_v39 = vadd.f32 %v2210_v35, %v2796_v19  ;;  %v437_v50 = vsel %vm370_vm1, %v419_v36, 0.0  ;;  %v361_v36 = vpop.f32.mrf.mxu1 }
 0x13c   :  { %v375_v41 = vadd.f32 %v374_v37, %v373_v34  ;;  %v311_v42 = vpop.f32.mrf.mxu0 }
 0x13d   :  { %v435_v44 = vsel %vm370_vm1, %v418_v38, 0.0  ;;  %v2833_v45 = vadd.f32 %v2796_v19, %v311_v42  ;;  %v421_v47 = vmul.f32 %v2827_v39, %v2827_v39  ;;  %v380_v57 = vsel %vm370_vm1, %v2827_v39, 0.0 }
 0x13e   :  { %v436_v46 = vadd.f32 %v435_v44, %v434_v40  ;;  %v377_v48 = vadd.f32 %v376_v43, %v375_v41  ;;  %v2213_v49 = vpop.f32.mrf.mxu0 }
 0x13f   :  { %v378_v51 = vsel %vm370_vm1, %v2833_v45, 0.0  ;;  %v420_v52 = vmul.f32 %v2833_v45, %v2833_v45  ;;  %v2843_v53 = vadd.f32 %v2213_v49, %v2796_v19  ;;  %v441_v60 = vsel %vm370_vm1, %v421_v47, 0.0 }
 0x140   :  { %v379_v54 = vadd.f32 %v378_v51, %v377_v48  ;;  %v438_v55 = vadd.f32 %v437_v50, %v436_v46  ;;  %v321_v56 = vpop.f32.mrf.mxu0  ;;  %v2903_v51 = vadd.f32 %v2796_v19, %v361_v36 }
 0x141   :  { %v439_v58 = vsel %vm370_vm1, %v420_v52, 0.0  ;;  %v2849_v59 = vadd.f32 %v2796_v19, %v321_v56  ;;  %v423_v0 = vmul.f32 %v2843_v53, %v2843_v53  ;;  %v384_v7 = vsel %vm370_vm1, %v2843_v53, 0.0 }
 0x142   :  { %v440_v61 = vadd.f32 %v439_v58, %v438_v55  ;;  %v381_v62 = vadd.f32 %v380_v57, %v379_v54  ;;  %v2216_v63 = vpop.f32.mrf.mxu0 }
 0x143   :  { %v382_v1 = vsel %vm370_vm1, %v2849_v59, 0.0  ;;  %v422_v2 = vmul.f32 %v2849_v59, %v2849_v59  ;;  %v2859_v3 = vadd.f32 %v2216_v63, %v2796_v19  ;;  %v445_v15 = vsel %vm370_vm1, %v423_v0, 0.0 }
 0x144   :  { %v383_v4 = vadd.f32 %v382_v1, %v381_v62  ;;  %v442_v5 = vadd.f32 %v441_v60, %v440_v61  ;;  %v331_v6 = vpop.f32.mrf.mxu0 }
 0x145   :  { %v443_v8 = vsel %vm370_vm1, %v422_v2, 0.0  ;;  %v2865_v9 = vadd.f32 %v2796_v19, %v331_v6  ;;  %v425_v12 = vmul.f32 %v2859_v3, %v2859_v3  ;;  %v393_v25 = vsel %vm370_vm1, %v2859_v3, 0.0 }
 0x146   :  { %v385_v10 = vadd.f32 %v384_v7, %v383_v4  ;;  %v444_v11 = vadd.f32 %v443_v8, %v442_v5  ;;  %v2219_v13 = vpop.f32.mrf.mxu0  ;;  %v430_v4 = vmul.f32 %v2903_v51, %v2903_v51 }
 0x147   :  { %v392_v16 = vsel %vm370_vm1, %v2865_v9, 0.0  ;;  %v424_v17 = vmul.f32 %v2865_v9, %v2865_v9  ;;  %v2875_v18 = vadd.f32 %v2219_v13, %v2796_v19  ;;  %v454_v33 = vsel %vm370_vm1, %v425_v12, 0.0 }
 0x148   :  { %v386_v20 = vrot.slane %v385_v10, 4  ;;  %v446_v22 = vadd.f32 %v445_v15, %v444_v11  ;;  %v341_v24 = vpop.f32.mrf.mxu0  ;;  %v394_v34 = vadd.f32 %v393_v25, %v392_v16  ;;  %v431_v11 = vmul.f32 %v2884_v29, %v2884_v29 }
 0x149   :  { %v453_v26 = vsel %vm370_vm1, %v424_v17, 0.0  ;;  %v2881_v27 = vadd.f32 %v2796_v19, %v341_v24  ;;  %v427_v37 = vmul.f32 %v2875_v18, %v2875_v18  ;;  %v397_v48 = vsel %vm370_vm1, %v2875_v18, 0.0 }
 0x14a   :  { %v387_v30 = vadd.f32 %v386_v20, %v385_v10  ;;  %v447_v31 = vrot.slane %v446_v22, 4  ;;  %v2222_v35 = vpop.f32.mrf.mxu0  ;;  %v455_v44 = vadd.f32 %v454_v33, %v453_v26  ;;  %v403_v12 = vsel %vm370_vm1, %v2903_v51, 0.0 }
 0x14b   :  { %v395_v38 = vsel %vm370_vm1, %v2881_v27, 0.0  ;;  %v426_v40 = vmul.f32 %v2881_v27, %v2881_v27  ;;  %v2894_v41 = vadd.f32 %v2222_v35, %v2796_v19  ;;  %v458_v57 = vsel %vm370_vm1, %v427_v37, 0.0 }
 0x14c   :  { %v388_v42 = vrot.slane %v387_v30, 2  ;;  %v448_v43 = vadd.f32 %v447_v31, %v446_v22  ;;  %v396_v46 = vadd.f32 %v395_v38, %v394_v34  ;;  %v351_v47 = vpop.f32.mrf.mxu0  ;;  %v405_v17 = vsel %vm370_vm1, %v2884_v29, 0.0 }
 0x14d   :  { %v456_v49 = vsel %vm370_vm1, %v426_v40, 0.0  ;;  %v2900_v50 = vadd.f32 %v2796_v19, %v351_v47  ;;  %v429_v58 = vmul.f32 %v2894_v41, %v2894_v41  ;;  %v401_v1 = vsel %vm370_vm1, %v2894_v41, 0.0 }
 0x14e   :  { %v389_v52 = vadd.f32 %v388_v42, %v387_v30  ;;  %v449_v54 = vrot.slane %v448_v43, 2  ;;  %v457_v55 = vadd.f32 %v456_v49, %v455_v44  ;;  %v398_v56 = vadd.f32 %v397_v48, %v396_v46 }
 0x14f   :  { %v399_v60 = vsel %vm370_vm1, %v2900_v50, 0.0  ;;  %v428_v61 = vmul.f32 %v2900_v50, %v2900_v50  ;;  %v462_v10 = vsel %vm370_vm1, %v429_v58, 0.0  ;;  %v464_v25 = vsel %vm370_vm1, %v430_v4, 0.0 }
 0x150   :  { %v390_v62 = vrot.slane %v389_v52, 1  ;;  %v450_v63 = vadd.f32 %v449_v54, %v448_v43  ;;  %v400_v0 = vadd.f32 %v399_v60, %v398_v56  ;;  %v459_v19 = vadd.f32 %v458_v57, %v457_v55 }
 0x151   :  { %v460_v2 = vsel %vm370_vm1, %v428_v61, 0.0  ;;  %v466_v31 = vsel %vm370_vm1, %v431_v11, 0.0 }
 0x152   :  { %v391_v5 = vadd.f32 %v390_v62, %v389_v52  ;;  %v451_v6 = vrot.slane %v450_v63, 1  ;;  %v461_v7 = vadd.f32 %v460_v2, %v459_v19  ;;  %v402_v8 = vadd.f32 %v401_v1, %v400_v0 }
 0x154   :  { %v2922_v13 = vmul.f32 0.015625, %v391_v5  ;;  %v452_v14 = vadd.f32 %v451_v6, %v450_v63  ;;  %v404_v15 = vadd.f32 %v403_v12, %v402_v8  ;;  %v463_v16 = vadd.f32 %v462_v10, %v461_v7 }
 0x156   :  { %v474_v20 = vmul.f32 0.015625, %v452_v14  ;;  %v476_v22 = vmul.f32 %v2922_v13, %v2922_v13  ;;  %v406_v24 = vadd.f32 %v405_v17, %v404_v15  ;;  %v465_v26 = vadd.f32 %v464_v25, %v463_v16 }
 0x157   :  { %v482_v58 = vsub.f32 %v2802_v23, %v2922_v13  ;;  %v483_v60 = vsub.f32 %v2799_v21, %v2922_v13  ;;  %v484_v61 = vsub.f32 %v2817_v32, %v2922_v13  ;;  %v485_v4 = vsub.f32 %v2811_v28, %v2922_v13 }
 0x158   :  { %v478_v30 = vsub.f32 %v474_v20, %v476_v22  ;;  %v407_v33 = vrot.slane %v406_v24, 4  ;;  %v467_v34 = vadd.f32 %v466_v31, %v465_v26  ;;  %v486_v23 = vsub.f32 %v2833_v45, %v2922_v13 }
 0x159   :  { %v487_v8 = vsub.f32 %v2827_v39, %v2922_v13  ;;  %v488_v10 = vsub.f32 %v2849_v59, %v2922_v13  ;;  %v489_v14 = vsub.f32 %v2843_v53, %v2922_v13 }
 0x15a   :  { %v480_v35 = vmax.f32 %v478_v30, 0.0  ;;  %v408_v36 = vadd.f32 %v407_v33, %v406_v24  ;;  %v468_v37 = vrot.slane %v467_v34, 4 }
 0x15c   :  { %v498_v38 = vadd.f32 1e-05, %v480_v35  ;;  %v409_v40 = vrot.slane %v408_v36, 2  ;;  %v469_v42 = vadd.f32 %v468_v37, %v467_v34 }
 0x15e   :  { %2388 = vrsqrt.f32 %v498_v38  ;;  %v410_v43 = vadd.f32 %v409_v40, %v408_v36  ;;  %v470_v44 = vrot.slane %v469_v42, 2 }
 0x160   :  { %v411_v46 = vrot.slane %v410_v43, 1  ;;  %v471_v47 = vadd.f32 %v470_v44, %v469_v42  ;;  %v900_v44 = vld [vmem:[%s3573_s5 + $0x8] sm:$0xff] }
 0x162   :  { %v412_v48 = vadd.f32 %v411_v46, %v410_v43  ;;  %v472_v49 = vrot.slane %v471_v47, 1  ;;  %v899_v46 = vld [vmem:[%s3573_s5] sm:$0xff] }
 0x164   :  { %v2930_v52 = vmul.f32 0.015625, %v412_v48  ;;  %v473_v54 = vadd.f32 %v472_v49, %v471_v47  ;;  %v2994_v47 = vld [vmem:[#allocation7] ss:$0 sm:$0xff] }
 0x166   :  { %v477_v55 = vmul.f32 %v2930_v52, %v2930_v52  ;;  %v475_v56 = vmul.f32 0.015625, %v473_v54  ;;  %v490_v59 = vsub.f32 %v2865_v9, %v2930_v52  ;;  %v491_v20 = vsub.f32 %v2859_v3, %v2930_v52 }
 0x167   :  { %v492_v22 = vsub.f32 %v2881_v27, %v2930_v52  ;;  %v493_v26 = vsub.f32 %v2875_v18, %v2930_v52  ;;  %v494_v9 = vsub.f32 %v2900_v50, %v2930_v52  ;;  %v495_v27 = vsub.f32 %v2894_v41, %v2930_v52 }
 0x168   :  { %v479_v57 = vsub.f32 %v475_v56, %v477_v55  ;;  %v496_v35 = vsub.f32 %v2903_v51, %v2930_v52  ;;  %v497_v50 = vsub.f32 %v2884_v29, %v2930_v52  ;;  %v902_v51 = vld [vmem:[%s3573_s5 + $0x18] sm:$0xff]  ;;  %v901_v29 = vld [vmem:[%s3573_s5 + $0x10] sm:$0xff] }
 0x169   :  { %2254 = vmatprep.subr.mxu0 %v902_v51 }
 0x16a   :  { %v481_v63 = vmax.f32 %v479_v57, 0.0  ;;  %2255 = vmatpush3.msra.mxu0 %v902_v51 }
 0x16b   :  { %v2389_v62 = vpop.eup %2388  ;;  %2256 = vmatprep.subr.mxu0 %v901_v29 }
 0x16c   :  { %v502_v0 = vmul.f32 %v2389_v62, %v482_v58  ;;  %v503_v19 = vmul.f32 %v2389_v62, %v483_v60  ;;  %v504_v1 = vmul.f32 %v2389_v62, %v484_v61  ;;  %v499_v2 = vadd.f32 1e-05, %v481_v63  ;;  %2257 = vmatpush3.msra.mxu0 %v901_v29 }
 0x16d   :  { %v505_v7 = vmul.f32 %v2389_v62, %v485_v4  ;;  %v506_v32 = vmul.f32 %v2389_v62, %v486_v23  ;;  %v507_v11 = vmul.f32 %v2389_v62, %v487_v8  ;;  %v508_v12 = vmul.f32 %v2389_v62, %v488_v10  ;;  %2258 = vmatprep.subr.mxu0 %v900_v44 }
 0x16e   :  { %v518_v5 = vmax.f32 %v502_v0, 0.0  ;;  %v519_v6 = vmax.f32 %v503_v19, 0.0  ;;  %2390 = vrsqrt.f32 %v499_v2  ;;  %v520_v21 = vmax.f32 %v504_v1, 0.0  ;;  %2259 = vmatpush3.msra.mxu0 %v900_v44 }
 0x16f   :  { %v521_v28 = vmax.f32 %v505_v7, 0.0  ;;  %v522_v45 = vmax.f32 %v506_v32, 0.0  ;;  %v523_v15 = vmax.f32 %v507_v11, 0.0  ;;  %v509_v16 = vmul.f32 %v2389_v62, %v489_v14  ;;  %2260 = vmatprep.subr.mxu0 %v899_v46 }
 0x170   :  { %2230 = vmatprep.mubr.msk.f32.mxu1 %vm370_vm1, %v518_v5  ;;  %v524_v17 = vmax.f32 %v508_v12, 0.0  ;;  %2261 = vmatpush3.msra.mxu0 %v899_v46 }
 0x171   :  { %2231 = vmatmul.mubr.msk.f32.vlgmr.msra.gmra.mxu1 %vm370_vm1, %v519_v6  ;;  %v525_v39 = vmax.f32 %v509_v16, 0.0 }
 0x172   :  { %2233 = vmatprep.mubr.msk.f32.mxu1 %vm370_vm1, %v520_v21 }
 0x175   :  { %2234 = vmatmul.mubr.msk.f32.gmra.mxu1 %vm370_vm1, %v521_v28 }
 0x176   :  { %2236 = vmatprep.mubr.msk.f32.mxu1 %vm370_vm1, %v522_v45 }
 0x179   :  { %2237 = vmatmul.mubr.msk.f32.gmra.mxu1 %vm370_vm1, %v523_v15 }
 0x17a   :  { %2239 = vmatprep.mubr.msk.f32.mxu1 %vm370_vm1, %v524_v17 }
 0x17b   :  { %v2391_v53 = vpop.eup %2390 }
 0x17c   :  { %v510_v13 = vmul.f32 %v2391_v53, %v490_v59  ;;  %v511_v24 = vmul.f32 %v2391_v53, %v491_v20  ;;  %v512_v25 = vmul.f32 %v2391_v53, %v492_v22  ;;  %v513_v33 = vmul.f32 %v2391_v53, %v493_v26 }
 0x17d   :  { %2240 = vmatmul.mubr.msk.f32.gmra.mxu1 %vm370_vm1, %v525_v39  ;;  %v514_v34 = vmul.f32 %v2391_v53, %v494_v9  ;;  %v515_v36 = vmul.f32 %v2391_v53, %v495_v27  ;;  %v516_v37 = vmul.f32 %v2391_v53, %v496_v35  ;;  %v517_v42 = vmul.f32 %v2391_v53, %v497_v50 }
 0x17e   :  { %v526_v30 = vmax.f32 %v510_v13, 0.0  ;;  %v527_v31 = vmax.f32 %v511_v24, 0.0  ;;  %v528_v3 = vmax.f32 %v512_v25, 0.0  ;;  %v529_v18 = vmax.f32 %v513_v33, 0.0 }
 0x17f   :  { %v530_v38 = vmax.f32 %v514_v34, 0.0  ;;  %v531_v40 = vmax.f32 %v515_v36, 0.0  ;;  %v532_v43 = vmax.f32 %v516_v37, 0.0  ;;  %v533_v41 = vmax.f32 %v517_v42, 0.0 }
 0x180   :  { %2242 = vmatprep.mubr.msk.f32.mxu1 %vm370_vm1, %v526_v30 }
 0x181   :  { %2243 = vmatmul.mubr.msk.f32.gmra.mxu1 %vm370_vm1, %v527_v31 }
 0x182   :  { %2245 = vmatprep.mubr.msk.f32.mxu1 %vm370_vm1, %v528_v3 }
 0x185   :  { %2246 = vmatmul.mubr.msk.f32.gmra.mxu1 %vm370_vm1, %v529_v18 }
 0x186   :  { %2248 = vmatprep.mubr.msk.f32.mxu1 %vm370_vm1, %v530_v38 }
 0x189   :  { %2249 = vmatmul.mubr.msk.f32.gmra.mxu1 %vm370_vm1, %v531_v40 }
 0x18a   :  { %2251 = vmatprep.mubr.msk.f32.mxu1 %vm370_vm1, %v532_v43 }
 0x18d   :  { %2252 = vmatmul.mubr.msk.f32.gmra.mxu1 %vm370_vm1, %v533_v41 }
 0x231   :  { %v2232_v48 = vpop.f32.mrf.mxu1 }
 0x232   :  { %v2997_v49 = vadd.f32 %v2232_v48, %v2994_v47 }
 0x233   :  { %v657_v52 = vpop.f32.mrf.mxu1 }
 0x234   :  { %v3000_v54 = vadd.f32 %v2994_v47, %v657_v52  ;;  %v782_v56 = vmul.f32 %v2997_v49, %v2997_v49  ;;  %v738_v62 = vsel %vm736_vm2, %v2997_v49, 0.0 }
 0x235   :  { %v2235_v55 = vpop.f32.mrf.mxu1 }
 0x236   :  { %v737_v57 = vsel %vm736_vm2, %v3000_v54, 0.0  ;;  %v781_v58 = vmul.f32 %v3000_v54, %v3000_v54  ;;  %v3009_v60 = vadd.f32 %v2235_v55, %v2994_v47  ;;  %v798_v4 = vsel %vm736_vm2, %v782_v56, 0.0 }
 0x237   :  { %v667_v61 = vpop.f32.mrf.mxu1  ;;  %v739_v19 = vadd.f32 %v738_v62, %v737_v57 }
 0x238   :  { %v797_v63 = vsel %vm736_vm2, %v781_v58, 0.0  ;;  %v3015_v0 = vadd.f32 %v2994_v47, %v667_v61  ;;  %v784_v1 = vmul.f32 %v3009_v60, %v3009_v60  ;;  %v742_v8 = vsel %vm736_vm2, %v3009_v60, 0.0 }
 0x239   :  { %v2238_v2 = vpop.f32.mrf.mxu1  ;;  %v799_v7 = vadd.f32 %v798_v4, %v797_v63 }
 0x23a   :  { %v740_v5 = vsel %vm736_vm2, %v3015_v0, 0.0  ;;  %v783_v6 = vmul.f32 %v3015_v0, %v3015_v0  ;;  %v3025_v23 = vadd.f32 %v2238_v2, %v2994_v47  ;;  %v802_v11 = vsel %vm736_vm2, %v784_v1, 0.0 }
 0x23b   :  { %v741_v21 = vadd.f32 %v740_v5, %v739_v19  ;;  %v677_v32 = vpop.f32.mrf.mxu1 }
 0x23c   :  { %v800_v10 = vsel %vm736_vm2, %v783_v6, 0.0  ;;  %v3031_v28 = vadd.f32 %v2994_v47, %v677_v32  ;;  %v786_v15 = vmul.f32 %v3025_v23, %v3025_v23  ;;  %v746_v53 = vsel %vm736_vm2, %v3025_v23, 0.0 }
 0x23d   :  { %v801_v12 = vadd.f32 %v800_v10, %v799_v7  ;;  %v743_v45 = vadd.f32 %v742_v8, %v741_v21  ;;  %v2241_v14 = vpop.f32.mrf.mxu1 }
 0x23e   :  { %v744_v16 = vsel %vm736_vm2, %v3031_v28, 0.0  ;;  %v785_v17 = vmul.f32 %v3031_v28, %v3031_v28  ;;  %v3041_v39 = vadd.f32 %v2241_v14, %v2994_v47  ;;  %v806_v30 = vsel %vm736_vm2, %v786_v15, 0.0 }
 0x23f   :  { %v745_v59 = vadd.f32 %v744_v16, %v743_v45  ;;  %v803_v20 = vadd.f32 %v802_v11, %v801_v12  ;;  %v687_v22 = vpop.f32.mrf.mxu1 }
 0x240   :  { %v804_v13 = vsel %vm736_vm2, %v785_v17, 0.0  ;;  %v3047_v24 = vadd.f32 %v2994_v47, %v687_v22  ;;  %v788_v31 = vmul.f32 %v3041_v39, %v3041_v39  ;;  %v750_v35 = vsel %vm736_vm2, %v3041_v39, 0.0 }
 0x241   :  { %v805_v25 = vadd.f32 %v804_v13, %v803_v20  ;;  %v747_v26 = vadd.f32 %v746_v53, %v745_v59  ;;  %v2244_v3 = vpop.f32.mrf.mxu1 }
 0x242   :  { %v748_v9 = vsel %vm736_vm2, %v3047_v24, 0.0  ;;  %v787_v33 = vmul.f32 %v3047_v24, %v3047_v24  ;;  %v3060_v36 = vadd.f32 %v2244_v3, %v2994_v47  ;;  %v810_v40 = vsel %vm736_vm2, %v788_v31, 0.0 }
 0x243   :  { %v749_v34 = vadd.f32 %v748_v9, %v747_v26  ;;  %v807_v27 = vadd.f32 %v806_v30, %v805_v25  ;;  %v697_v37 = vpop.f32.mrf.mxu1 }
 0x244   :  { %v808_v18 = vsel %vm736_vm2, %v787_v33, 0.0  ;;  %v3064_v42 = vadd.f32 %v2994_v47, %v697_v37  ;;  %v790_v44 = vmul.f32 %v3060_v36, %v3060_v36  ;;  %v759_v57 = vsel %vm736_vm2, %v3060_v36, 0.0 }
 0x245   :  { %v751_v38 = vadd.f32 %v750_v35, %v749_v34  ;;  %v809_v50 = vadd.f32 %v808_v18, %v807_v27  ;;  %v2247_v43 = vpop.f32.mrf.mxu1 }
 0x246   :  { %v3067_v29 = vadd.f32 %v2247_v43, %v2994_v47  ;;  %v758_v46 = vsel %vm736_vm2, %v3064_v42, 0.0  ;;  %v789_v48 = vmul.f32 %v3064_v42, %v3064_v42  ;;  %v819_v4 = vsel %vm736_vm2, %v790_v44, 0.0 }
 0x247   :  { %v752_v41 = vrot.slane %v751_v38, 4  ;;  %v811_v51 = vadd.f32 %v810_v40, %v809_v50  ;;  %v707_v52 = vpop.f32.mrf.mxu1  ;;  %v760_v2 = vadd.f32 %v759_v57, %v758_v46 }
 0x248   :  { %v818_v58 = vsel %vm736_vm2, %v789_v48, 0.0  ;;  %v792_v61 = vmul.f32 %v3067_v29, %v3067_v29  ;;  %v3081_v62 = vadd.f32 %v2994_v47, %v707_v52  ;;  %v763_v12 = vsel %vm736_vm2, %v3067_v29, 0.0 }
 0x249   :  { %v753_v55 = vadd.f32 %v752_v41, %v751_v38  ;;  %v812_v56 = vrot.slane %v811_v51, 4  ;;  %v2250_v63 = vpop.f32.mrf.mxu1  ;;  %v820_v10 = vadd.f32 %v819_v4, %v818_v58 }
 0x24a   :  { %v761_v5 = vsel %vm736_vm2, %v3081_v62, 0.0  ;;  %v791_v6 = vmul.f32 %v3081_v62, %v3081_v62  ;;  %v3089_v7 = vadd.f32 %v2250_v63, %v2994_v47  ;;  %v823_v45 = vsel %vm736_vm2, %v792_v61, 0.0 }
 0x24b   :  { %v754_v19 = vrot.slane %v753_v55, 2  ;;  %v813_v1 = vadd.f32 %v812_v56, %v811_v51  ;;  %v717_v21 = vpop.f32.mrf.mxu1  ;;  %v762_v11 = vadd.f32 %v761_v5, %v760_v2 }
 0x24c   :  { %v821_v14 = vsel %vm736_vm2, %v791_v6, 0.0  ;;  %v3096_v15 = vadd.f32 %v2994_v47, %v717_v21  ;;  %v794_v53 = vmul.f32 %v3089_v7, %v3089_v7  ;;  %v767_v34 = vsel %vm736_vm2, %v3089_v7, 0.0 }
 0x24d   :  { %v755_v32 = vadd.f32 %v754_v19, %v753_v55  ;;  %v814_v8 = vrot.slane %v813_v1, 2  ;;  %v2253_v16 = vpop.f32.mrf.mxu1  ;;  %v822_v20 = vadd.f32 %v821_v14, %v820_v10  ;;  %v764_v22 = vadd.f32 %v763_v12, %v762_v11 }
 0x24e   :  { %v765_v13 = vsel %vm736_vm2, %v3096_v15, 0.0  ;;  %v793_v25 = vmul.f32 %v3096_v15, %v3096_v15  ;;  %v3105_v26 = vadd.f32 %v2253_v16, %v2994_v47  ;;  %v827_v40 = vsel %vm736_vm2, %v794_v53, 0.0 }
 0x24f   :  { %v756_v17 = vrot.slane %v755_v32, 1  ;;  %v815_v59 = vadd.f32 %v814_v8, %v813_v1  ;;  %v727_v30 = vpop.f32.mrf.mxu1  ;;  %v766_v33 = vadd.f32 %v765_v13, %v764_v22  ;;  %v824_v3 = vadd.f32 %v823_v45, %v822_v20 }
 0x250   :  { %v825_v27 = vsel %vm736_vm2, %v793_v25, 0.0  ;;  %v3111_v35 = vadd.f32 %v2994_v47, %v727_v30  ;;  %v796_v47 = vmul.f32 %v3105_v26, %v3105_v26  ;;  %v771_v48 = vsel %vm736_vm2, %v3105_v26, 0.0 }
 0x251   :  { %v757_v31 = vadd.f32 %v756_v17, %v755_v32  ;;  %v816_v9 = vrot.slane %v815_v59, 1  ;;  %v826_v38 = vadd.f32 %v825_v27, %v824_v3  ;;  %v768_v50 = vadd.f32 %v767_v34, %v766_v33 }
 0x252   :  { %v769_v43 = vsel %vm736_vm2, %v3111_v35, 0.0  ;;  %v795_v41 = vmul.f32 %v3111_v35, %v3111_v35  ;;  %v831_v63 = vsel %vm736_vm2, %v796_v47, 0.0 }
 0x253   :  { %v3113_v18 = vmul.f32 0.015625, %v757_v31  ;;  %v817_v37 = vadd.f32 %v816_v9, %v815_v59  ;;  %v770_v46 = vadd.f32 %v769_v43, %v768_v50  ;;  %v828_v52 = vadd.f32 %v827_v40, %v826_v38 }
 0x254   :  { %v829_v55 = vsel %vm736_vm2, %v795_v41, 0.0 }
 0x255   :  { %v839_v51 = vmul.f32 0.015625, %v817_v37  ;;  %v841_v44 = vmul.f32 %v3113_v18, %v3113_v18  ;;  %v772_v57 = vadd.f32 %v771_v48, %v770_v46  ;;  %v830_v58 = vadd.f32 %v829_v55, %v828_v52 }
 0x256   :  { %v847_v20 = vsub.f32 %v3000_v54, %v3113_v18  ;;  %v848_v22 = vsub.f32 %v2997_v49, %v3113_v18  ;;  %v849_v53 = vsub.f32 %v3015_v0, %v3113_v18  ;;  %v850_v3 = vsub.f32 %v3009_v60, %v3113_v18 }
 0x257   :  { %v843_v56 = vsub.f32 %v839_v51, %v841_v44  ;;  %v773_v19 = vrot.slane %v772_v57, 4  ;;  %v832_v1 = vadd.f32 %v831_v63, %v830_v58  ;;  %v851_v54 = vsub.f32 %v3031_v28, %v3113_v18 }
 0x258   :  { %v852_v50 = vsub.f32 %v3025_v23, %v3113_v18  ;;  %v853_v60 = vsub.f32 %v3047_v24, %v3113_v18  ;;  %v854_v51 = vsub.f32 %v3041_v39, %v3113_v18 }
 0x259   :  { %v845_v61 = vmax.f32 %v843_v56, 0.0  ;;  %v774_v4 = vadd.f32 %v773_v19, %v772_v57  ;;  %v833_v5 = vrot.slane %v832_v1, 4 }
 0x25b   :  { %v863_v2 = vadd.f32 1e-05, %v845_v61  ;;  %v775_v6 = vrot.slane %v774_v4, 2  ;;  %v834_v21 = vadd.f32 %v833_v5, %v832_v1 }
 0x25d   :  { %2392 = vrsqrt.f32 %v863_v2  ;;  %v776_v32 = vadd.f32 %v775_v6, %v774_v4  ;;  %v835_v8 = vrot.slane %v834_v21, 2 }
 0x25f   :  { %v777_v10 = vrot.slane %v776_v32, 1  ;;  %v836_v11 = vadd.f32 %v835_v8, %v834_v21  ;;  %v1335_v8 = vld [vmem:[%s3575_s7 + $0x38] sm:$0xff] }
 0x261   :  { %v778_v12 = vadd.f32 %v777_v10, %v776_v32  ;;  %v837_v45 = vrot.slane %v836_v11, 1  ;;  %v1333_v10 = vld [vmem:[%s3575_s7 + $0x28] sm:$0xff] }
 0x263   :  { %v3128_v14 = vmul.f32 0.015625, %v778_v12  ;;  %v838_v16 = vadd.f32 %v837_v45, %v836_v11  ;;  %v1332_v11 = vld [vmem:[%s3575_s7 + $0x20] sm:$0xff]  ;;  %v1331_v12 = vld [vmem:[%s3575_s7 + $0x18] sm:$0xff]  ;;  %v1330_v45 = vld [vmem:[%s3575_s7 + $0x10] sm:$0xff] }
 0x265   :  { %v842_v17 = vmul.f32 %v3128_v14, %v3128_v14  ;;  %v840_v59 = vmul.f32 0.015625, %v838_v16  ;;  %v855_v24 = vsub.f32 %v3064_v42, %v3128_v14  ;;  %v856_v48 = vsub.f32 %v3060_v36, %v3128_v14  ;;  %v1328_v16 = vld [vmem:[%s3575_s7] sm:$0xff] }
 0x266   :  { %v857_v39 = vsub.f32 %v3081_v62, %v3128_v14  ;;  %v858_v57 = vsub.f32 %v3067_v29, %v3128_v14  ;;  %v859_v63 = vsub.f32 %v3096_v15, %v3128_v14  ;;  %v860_v62 = vsub.f32 %v3089_v7, %v3128_v14 }
 0x267   :  { %v844_v25 = vsub.f32 %v840_v59, %v842_v17  ;;  %v861_v1 = vsub.f32 %v3111_v35, %v3128_v14  ;;  %v862_v15 = vsub.f32 %v3105_v26, %v3128_v14  ;;  %v2612_v35 = vmov 0.0   ;;  %v1334_v26 = vld [vmem:[%s3575_s7 + $0x30] sm:$0xff]  ;;  %v1329_v14 = vld [vmem:[%s3575_s7 + $0x8] sm:$0xff]  ;;  %v3218_v17 = vld [vmem:[#allocation8] ss:$0 sm:$0xff] }
 0x268   :  { %2286 = vmatprep.subr.mxu1 %v2612_v35  ;;  %2324 = vmatprep.subr.mxu0 %v2612_v35 }
 0x269   :  { %v846_v33 = vmax.f32 %v844_v25, 0.0  ;;  %2287 = vmatpush3.msra.mxu1 %v1335_v8  ;;  %2302 = vmatprep.mubr.msk.f32.mxu1 %vm2613_vm3, %v2612_v35 }
 0x26a   :  { %v2393_v13 = vpop.eup %2392  ;;  %2288 = vmatprep.subr.mxu1 %v2612_v35 }
 0x26b   :  { %v867_v30 = vmul.f32 %v2393_v13, %v847_v20  ;;  %v868_v31 = vmul.f32 %v2393_v13, %v848_v22  ;;  %v869_v9 = vmul.f32 %v2393_v13, %v849_v53  ;;  %v864_v37 = vadd.f32 1e-05, %v846_v33  ;;  %2289 = vmatpush3.msra.mxu1 %v1334_v26 }
 0x26c   :  { %v870_v38 = vmul.f32 %v2393_v13, %v850_v3  ;;  %v871_v0 = vmul.f32 %v2393_v13, %v851_v54  ;;  %v872_v43 = vmul.f32 %v2393_v13, %v852_v50  ;;  %v873_v28 = vmul.f32 %v2393_v13, %v853_v60  ;;  %2290 = vmatprep.subr.mxu1 %v2612_v35 }
 0x26d   :  { %v883_v34 = vmax.f32 %v867_v30, 0.0  ;;  %v884_v27 = vmax.f32 %v868_v31, 0.0  ;;  %v885_v49 = vmax.f32 %v869_v9, 0.0  ;;  %2394 = vrsqrt.f32 %v864_v37  ;;  %2291 = vmatpush3.msra.mxu1 %v1333_v10 }
 0x26e   :  { %v886_v40 = vmax.f32 %v870_v38, 0.0  ;;  %v887_v41 = vmax.f32 %v871_v0, 0.0  ;;  %v888_v44 = vmax.f32 %v872_v43, 0.0  ;;  %v874_v47 = vmul.f32 %v2393_v13, %v854_v51  ;;  %2292 = vmatprep.subr.mxu1 %v2612_v35 }
 0x26f   :  { %2262 = vmatprep.mubr.msk.f32.mxu0 %vm736_vm2, %v883_v34  ;;  %v889_v46 = vmax.f32 %v873_v28, 0.0  ;;  %2293 = vmatpush3.msra.mxu1 %v1332_v11 }
 0x270   :  { %2263 = vmatmul.mubr.msk.f32.vlgmr.msra.gmra.mxu0 %vm736_vm2, %v884_v27  ;;  %v890_v23 = vmax.f32 %v874_v47, 0.0  ;;  %2294 = vmatprep.subr.mxu1 %v2612_v35 }
 0x271   :  { %2265 = vmatprep.mubr.msk.f32.mxu0 %vm736_vm2, %v885_v49  ;;  %2295 = vmatpush3.msra.mxu1 %v1331_v12 }
 0x272   :  { %2296 = vmatprep.subr.mxu1 %v2612_v35 }
 0x273   :  { %2297 = vmatpush3.msra.mxu1 %v1330_v45 }
 0x274   :  { %2266 = vmatmul.mubr.msk.f32.gmra.mxu0 %vm736_vm2, %v886_v40  ;;  %2298 = vmatprep.subr.mxu1 %v2612_v35 }
 0x275   :  { %2268 = vmatprep.mubr.msk.f32.mxu0 %vm736_vm2, %v887_v41  ;;  %2299 = vmatpush3.msra.mxu1 %v1329_v14 }
 0x276   :  { %2300 = vmatprep.subr.mxu1 %v2612_v35 }
 0x277   :  { %2301 = vmatpush3.msra.mxu1 %v1328_v16 }
 0x278   :  { %2269 = vmatmul.mubr.msk.f32.gmra.mxu0 %vm736_vm2, %v888_v44  ;;  %2305 = vmatprep.subr.mxu1 %v2612_v35 }
 0x279   :  { %2271 = vmatprep.mubr.msk.f32.mxu0 %vm736_vm2, %v889_v46 }
 0x27a   :  { %v2395_v18 = vpop.eup %2394 }
 0x27b   :  { %v875_v52 = vmul.f32 %v2395_v18, %v855_v24  ;;  %v876_v55 = vmul.f32 %v2395_v18, %v856_v48  ;;  %v877_v56 = vmul.f32 %v2395_v18, %v857_v39  ;;  %v878_v19 = vmul.f32 %v2395_v18, %v858_v57 }
 0x27c   :  { %2272 = vmatmul.mubr.msk.f32.gmra.mxu0 %vm736_vm2, %v890_v23  ;;  %v879_v36 = vmul.f32 %v2395_v18, %v859_v63  ;;  %v880_v2 = vmul.f32 %v2395_v18, %v860_v62  ;;  %v881_v4 = vmul.f32 %v2395_v18, %v861_v1  ;;  %v882_v21 = vmul.f32 %v2395_v18, %v862_v15 }
 0x27d   :  { %v891_v58 = vmax.f32 %v875_v52, 0.0  ;;  %v892_v61 = vmax.f32 %v876_v55, 0.0  ;;  %v893_v42 = vmax.f32 %v877_v56, 0.0  ;;  %v894_v29 = vmax.f32 %v878_v19, 0.0 }
 0x27e   :  { %v895_v5 = vmax.f32 %v879_v36, 0.0  ;;  %v896_v6 = vmax.f32 %v880_v2, 0.0  ;;  %v897_v32 = vmax.f32 %v881_v4, 0.0  ;;  %v898_v7 = vmax.f32 %v882_v21, 0.0 }
 0x27f   :  { %2274 = vmatprep.mubr.msk.f32.mxu0 %vm736_vm2, %v891_v58 }
 0x280   :  { %2275 = vmatmul.mubr.msk.f32.gmra.mxu0 %vm736_vm2, %v892_v61 }
 0x281   :  { %2277 = vmatprep.mubr.msk.f32.mxu0 %vm736_vm2, %v893_v42 }
 0x284   :  { %2278 = vmatmul.mubr.msk.f32.gmra.mxu0 %vm736_vm2, %v894_v29 }
 0x285   :  { %2280 = vmatprep.mubr.msk.f32.mxu0 %vm736_vm2, %v895_v5 }
 0x288   :  { %2281 = vmatmul.mubr.msk.f32.gmra.mxu0 %vm736_vm2, %v896_v6 }
 0x289   :  { %2283 = vmatprep.mubr.msk.f32.mxu0 %vm736_vm2, %v897_v32 }
 0x28c   :  { %2284 = vmatmul.mubr.msk.f32.gmra.mxu0 %vm736_vm2, %v898_v7 }
 0x28d   :  { %2340 = vmatprep.mubr.msk.f32.mxu0 %vm2613_vm3, %v2612_v35 }
 0x330   :  { %v2264_v59 = vpop.f32.mrf.mxu0 }
 0x331   :  { %v3221_v20 = vadd.f32 %v2264_v59, %v3218_v17 }
 0x332   :  { %v1024_v22 = vpop.f32.mrf.mxu0 }
 0x333   :  { %v3224_v53 = vadd.f32 %v3218_v17, %v1024_v22  ;;  %v1149_v25 = vmul.f32 %v3221_v20, %v3221_v20  ;;  %v1105_v3 = vsel %vm1103_vm4, %v3221_v20, 0.0 }
 0x334   :  { %v2267_v13 = vpop.f32.mrf.mxu0 }
 0x335   :  { %v1104_v30 = vsel %vm1103_vm4, %v3224_v53, 0.0  ;;  %v1148_v31 = vmul.f32 %v3224_v53, %v3224_v53  ;;  %v3233_v9 = vadd.f32 %v2267_v13, %v3218_v17  ;;  %v1165_v49 = vsel %vm1103_vm4, %v1149_v25, 0.0 }
 0x336   :  { %v1034_v33 = vpop.f32.mrf.mxu0  ;;  %v1106_v54 = vadd.f32 %v1105_v3, %v1104_v30 }
 0x337   :  { %v1164_v34 = vsel %vm1103_vm4, %v1148_v31, 0.0  ;;  %v3239_v27 = vadd.f32 %v3218_v17, %v1034_v33  ;;  %v1151_v37 = vmul.f32 %v3233_v9, %v3233_v9  ;;  %v1109_v41 = vsel %vm1103_vm4, %v3233_v9, 0.0 }
 0x338   :  { %v2270_v38 = vpop.f32.mrf.mxu0  ;;  %v1166_v40 = vadd.f32 %v1165_v49, %v1164_v34 }
 0x339   :  { %v1107_v0 = vsel %vm1103_vm4, %v3239_v27, 0.0  ;;  %v1150_v50 = vmul.f32 %v3239_v27, %v3239_v27  ;;  %v3249_v60 = vadd.f32 %v2270_v38, %v3218_v17  ;;  %v1169_v47 = vsel %vm1103_vm4, %v1151_v37, 0.0 }
 0x33a   :  { %v1108_v43 = vadd.f32 %v1107_v0, %v1106_v54  ;;  %v1044_v28 = vpop.f32.mrf.mxu0 }
 0x33b   :  { %v1167_v51 = vsel %vm1103_vm4, %v1150_v50, 0.0  ;;  %v3255_v44 = vadd.f32 %v3218_v17, %v1044_v28  ;;  %v1153_v48 = vmul.f32 %v3249_v60, %v3249_v60  ;;  %v1113_v58 = vsel %vm1103_vm4, %v3249_v60, 0.0 }
 0x33c   :  { %v1168_v46 = vadd.f32 %v1167_v51, %v1166_v40  ;;  %v1110_v23 = vadd.f32 %v1109_v41, %v1108_v43  ;;  %v2273_v24 = vpop.f32.mrf.mxu0 }
 0x33d   :  { %v1111_v39 = vsel %vm1103_vm4, %v3255_v44, 0.0  ;;  %v1152_v18 = vmul.f32 %v3255_v44, %v3255_v44  ;;  %v3265_v52 = vadd.f32 %v2273_v24, %v3218_v17  ;;  %v1173_v36 = vsel %vm1103_vm4, %v1153_v48, 0.0 }
 0x33e   :  { %v1112_v55 = vadd.f32 %v1111_v39, %v1110_v23  ;;  %v1170_v56 = vadd.f32 %v1169_v47, %v1168_v46  ;;  %v1054_v57 = vpop.f32.mrf.mxu0 }
 0x33f   :  { %v1171_v61 = vsel %vm1103_vm4, %v1152_v18, 0.0  ;;  %v3271_v63 = vadd.f32 %v3218_v17, %v1054_v57  ;;  %v1155_v62 = vmul.f32 %v3265_v52, %v3265_v52  ;;  %v1117_v5 = vsel %vm1103_vm4, %v3265_v52, 0.0 }
 0x340   :  { %v1172_v19 = vadd.f32 %v1171_v61, %v1170_v56  ;;  %v1114_v42 = vadd.f32 %v1113_v58, %v1112_v55  ;;  %v2276_v6 = vpop.f32.mrf.mxu0 }
 0x341   :  { %v1115_v1 = vsel %vm1103_vm4, %v3271_v63, 0.0  ;;  %v1154_v29 = vmul.f32 %v3271_v63, %v3271_v63  ;;  %v1177_v7 = vsel %vm1103_vm4, %v1155_v62, 0.0  ;;  %v3285_v8 = vadd.f32 %v2276_v6, %v3218_v17 }
 0x342   :  { %v1116_v2 = vadd.f32 %v1115_v1, %v1114_v42  ;;  %v1174_v4 = vadd.f32 %v1173_v36, %v1172_v19  ;;  %v1064_v26 = vpop.f32.mrf.mxu0 }
 0x343   :  { %v1175_v15 = vsel %vm1103_vm4, %v1154_v29, 0.0  ;;  %v3288_v12 = vadd.f32 %v3218_v17, %v1064_v26  ;;  %v1157_v22 = vmul.f32 %v3285_v8, %v3285_v8  ;;  %v1126_v3 = vsel %vm1103_vm4, %v3285_v8, 0.0 }
 0x344   :  { %v1118_v21 = vadd.f32 %v1117_v5, %v1116_v2  ;;  %v1176_v32 = vadd.f32 %v1175_v15, %v1174_v4  ;;  %v2279_v45 = vpop.f32.mrf.mxu0 }
 0x345   :  { %v3291_v59 = vadd.f32 %v2279_v45, %v3218_v17  ;;  %v1125_v13 = vsel %vm1103_vm4, %v3288_v12, 0.0  ;;  %v1156_v25 = vmul.f32 %v3288_v12, %v3288_v12  ;;  %v1186_v40 = vsel %vm1103_vm4, %v1157_v22, 0.0 }
 0x346   :  { %v1119_v10 = vrot.slane %v1118_v21, 4  ;;  %v1178_v11 = vadd.f32 %v1177_v7, %v1176_v32  ;;  %v1074_v30 = vpop.f32.mrf.mxu0  ;;  %v1127_v50 = vadd.f32 %v1126_v3, %v1125_v13 }
 0x347   :  { %v1185_v34 = vsel %vm1103_vm4, %v1156_v25, 0.0  ;;  %v1159_v54 = vmul.f32 %v3291_v59, %v3291_v59  ;;  %v3305_v37 = vadd.f32 %v3218_v17, %v1074_v30  ;;  %v1130_v48 = vsel %vm1103_vm4, %v3291_v59, 0.0 }
 0x348   :  { %v1120_v14 = vadd.f32 %v1119_v10, %v1118_v21  ;;  %v1179_v16 = vrot.slane %v1178_v11, 4  ;;  %v2282_v38 = vpop.f32.mrf.mxu0  ;;  %v1187_v23 = vadd.f32 %v1186_v40, %v1185_v34 }
 0x349   :  { %v1128_v43 = vsel %vm1103_vm4, %v3305_v37, 0.0  ;;  %v1158_v28 = vmul.f32 %v3305_v37, %v3305_v37  ;;  %v3313_v41 = vadd.f32 %v2282_v38, %v3218_v17  ;;  %v1190_v39 = vsel %vm1103_vm4, %v1159_v54, 0.0 }
 0x34a   :  { %v1121_v31 = vrot.slane %v1120_v14, 2  ;;  %v1180_v33 = vadd.f32 %v1179_v16, %v1178_v11  ;;  %v1084_v51 = vpop.f32.mrf.mxu0  ;;  %v1129_v24 = vadd.f32 %v1128_v43, %v1127_v50 }
 0x34b   :  { %v1188_v18 = vsel %vm1103_vm4, %v1158_v28, 0.0  ;;  %v3320_v55 = vadd.f32 %v3218_v17, %v1084_v51  ;;  %v1161_v42 = vmul.f32 %v3313_v41, %v3313_v41  ;;  %v1134_v26 = vsel %vm1103_vm4, %v3313_v41, 0.0 }
 0x34c   :  { %v1122_v49 = vadd.f32 %v1121_v31, %v1120_v14  ;;  %v1181_v0 = vrot.slane %v1180_v33, 2  ;;  %v2285_v56 = vpop.f32.mrf.mxu0  ;;  %v1189_v61 = vadd.f32 %v1188_v18, %v1187_v23  ;;  %v1131_v19 = vadd.f32 %v1130_v48, %v1129_v24 }
 0x34d   :  { %v1132_v36 = vsel %vm1103_vm4, %v3320_v55, 0.0  ;;  %v1160_v62 = vmul.f32 %v3320_v55, %v3320_v55  ;;  %v3329_v1 = vadd.f32 %v2285_v56, %v3218_v17  ;;  %v1194_v16 = vsel %vm1103_vm4, %v1161_v42, 0.0 }
 0x34e   :  { %v1123_v47 = vrot.slane %v1122_v49, 1  ;;  %v1182_v46 = vadd.f32 %v1181_v0, %v1180_v33  ;;  %v1094_v29 = vpop.f32.mrf.mxu0  ;;  %v1133_v5 = vadd.f32 %v1132_v36, %v1131_v19  ;;  %v1191_v15 = vadd.f32 %v1190_v39, %v1189_v61 }
 0x34f   :  { %v1192_v6 = vsel %vm1103_vm4, %v1160_v62, 0.0  ;;  %v3333_v21 = vadd.f32 %v3218_v17, %v1094_v29  ;;  %v1163_v22 = vmul.f32 %v3329_v1, %v3329_v1  ;;  %v1138_v31 = vsel %vm1103_vm4, %v3329_v1, 0.0 }
 0x350   :  { %v1124_v57 = vadd.f32 %v1123_v47, %v1122_v49  ;;  %v1183_v58 = vrot.slane %v1182_v46, 1  ;;  %v1193_v10 = vadd.f32 %v1192_v6, %v1191_v15  ;;  %v1135_v11 = vadd.f32 %v1134_v26, %v1133_v5 }
 0x351   :  { %v1136_v45 = vsel %vm1103_vm4, %v3333_v21, 0.0  ;;  %v1162_v17 = vmul.f32 %v3333_v21, %v3333_v21  ;;  %v1198_v38 = vsel %vm1103_vm4, %v1163_v22, 0.0 }
 0x352   :  { %v1146_v2 = vmul.f32 0.015625, %v1124_v57  ;;  %v1184_v4 = vadd.f32 %v1183_v58, %v1182_v46  ;;  %v1137_v13 = vadd.f32 %v1136_v45, %v1135_v11  ;;  %v1195_v25 = vadd.f32 %v1194_v16, %v1193_v10 }
 0x353   :  { %v1196_v33 = vsel %vm1103_vm4, %v1162_v17, 0.0 }
 0x354   :  { %v1206_v32 = vmul.f32 0.015625, %v1184_v4  ;;  %v1208_v7 = vmul.f32 %v1146_v2, %v1146_v2  ;;  %v1139_v3 = vadd.f32 %v1138_v31, %v1137_v13  ;;  %v1197_v34 = vadd.f32 %v1196_v33, %v1195_v25 }
 0x355   :  { %v1220_v56 = vsub.f32 %v3271_v63, %v1146_v2  ;;  %v1221_v58 = vsub.f32 %v3265_v52, %v1146_v2  ;;  %v1214_v36 = vsub.f32 %v3224_v53, %v1146_v2  ;;  %v1215_v4 = vsub.f32 %v3221_v20, %v1146_v2 }
 0x356   :  { %v1210_v14 = vsub.f32 %v1206_v32, %v1208_v7  ;;  %v1140_v49 = vrot.slane %v1139_v3, 4  ;;  %v1199_v0 = vadd.f32 %v1198_v38, %v1197_v34  ;;  %v1216_v5 = vsub.f32 %v3239_v27, %v1146_v2 }
 0x357   :  { %v1217_v15 = vsub.f32 %v3233_v9, %v1146_v2  ;;  %v1218_v63 = vsub.f32 %v3255_v44, %v1146_v2  ;;  %v1219_v6 = vsub.f32 %v3249_v60, %v1146_v2 }
 0x358   :  { %v1212_v30 = vmax.f32 %v1210_v14, 0.0  ;;  %v1141_v50 = vadd.f32 %v1140_v49, %v1139_v3  ;;  %v1200_v40 = vrot.slane %v1199_v0, 4 }
 0x35a   :  { %v1230_v54 = vadd.f32 1e-05, %v1212_v30  ;;  %v1142_v43 = vrot.slane %v1141_v50, 2  ;;  %v1201_v28 = vadd.f32 %v1200_v40, %v1199_v0 }
 0x35c   :  { %2396 = vrsqrt.f32 %v1230_v54  ;;  %v1143_v51 = vadd.f32 %v1142_v43, %v1141_v50  ;;  %v1202_v47 = vrot.slane %v1201_v28, 2 }
 0x35e   :  { %v1144_v46 = vrot.slane %v1143_v51, 1  ;;  %v1203_v23 = vadd.f32 %v1202_v47, %v1201_v28 }
 0x360   :  { %v1145_v24 = vadd.f32 %v1144_v46, %v1143_v51  ;;  %v1204_v48 = vrot.slane %v1203_v23, 1 }
 0x362   :  { %v3348_v39 = vmul.f32 0.015625, %v1145_v24  ;;  %v1205_v18 = vadd.f32 %v1204_v48, %v1203_v23 }
 0x364   :  { %v1207_v61 = vmul.f32 0.015625, %v1205_v18  ;;  %v1209_v19 = vmul.f32 %v3348_v39, %v3348_v39  ;;  %v1228_v51 = vsub.f32 %v3333_v21, %v3348_v39  ;;  %v1229_v47 = vsub.f32 %v3329_v1, %v3348_v39 }
 0x365   :  { %v1222_v46 = vsub.f32 %v3288_v12, %v3348_v39  ;;  %v1223_v23 = vsub.f32 %v3285_v8, %v3348_v39  ;;  %v1224_v24 = vsub.f32 %v3305_v37, %v3348_v39  ;;  %v1225_v48 = vsub.f32 %v3291_v59, %v3348_v39 }
 0x366   :  { %v1211_v29 = vsub.f32 %v1207_v61, %v1209_v19  ;;  %v1226_v18 = vsub.f32 %v3320_v55, %v3348_v39  ;;  %v1227_v21 = vsub.f32 %v3313_v41, %v3348_v39 }
 0x368   :  { %v1213_v7 = vmax.f32 %v1211_v29, 0.0 }
 0x369   :  { %v2397_v57 = vpop.eup %2396 }
 0x36a   :  { %v1240_v42 = vmul.f32 %v2397_v57, %v1220_v56  ;;  %v1241_v62 = vmul.f32 %v2397_v57, %v1221_v58  ;;  %v1234_v52 = vmul.f32 %v2397_v57, %v1214_v36  ;;  %v1235_v26 = vmul.f32 %v2397_v57, %v1215_v4 }
 0x36b   :  { %v1236_v10 = vmul.f32 %v2397_v57, %v1216_v5  ;;  %v1237_v11 = vmul.f32 %v2397_v57, %v1217_v15  ;;  %v1238_v53 = vmul.f32 %v2397_v57, %v1218_v63  ;;  %v1239_v45 = vmul.f32 %v2397_v57, %v1219_v6 }
 0x36c   :  { %v1277_v32 = vsel %vm1103_vm4, %v1240_v42, -inf  ;;  %v1250_v14 = vsel %vm1103_vm4, %v1234_v52, -inf  ;;  %v1278_v20 = vsel %vm1103_vm4, %v1241_v62, -inf  ;;  %v1231_v27 = vadd.f32 1e-05, %v1213_v7 }
 0x36d   :  { %v1251_v9 = vsel %vm1103_vm4, %v1235_v26, -inf  ;;  %v1259_v44 = vsel %vm1103_vm4, %v1236_v10, -inf  ;;  %v1260_v60 = vsel %vm1103_vm4, %v1237_v11, -inf  ;;  %v1268_v2 = vsel %vm1103_vm4, %v1238_v53, -inf }
 0x36e   :  { %v1252_v16 = vmax.f32 %v1250_v14, %v1251_v9  ;;  %v1269_v22 = vsel %vm1103_vm4, %v1239_v45, -inf  ;;  %2398 = vrsqrt.f32 %v1231_v27  ;;  %v1261_v17 = vmax.f32 %v1259_v44, %v1260_v60 }
 0x36f   :  { %v1270_v13 = vmax.f32 %v1268_v2, %v1269_v22  ;;  %v1279_v25 = vmax.f32 %v1277_v32, %v1278_v20 }
 0x370   :  { %v1253_v30 = vrot.slane %v1252_v16, 4  ;;  %v1262_v31 = vrot.slane %v1261_v17, 4 }
 0x371   :  { %v1271_v33 = vrot.slane %v1270_v13, 4  ;;  %v1280_v54 = vrot.slane %v1279_v25, 4 }
 0x372   :  { %v1254_v3 = vmax.f32 %v1252_v16, %v1253_v30  ;;  %v1263_v34 = vmax.f32 %v1261_v17, %v1262_v31 }
 0x373   :  { %v1272_v49 = vmax.f32 %v1270_v13, %v1271_v33  ;;  %v1281_v50 = vmax.f32 %v1279_v25, %v1280_v54 }
 0x374   :  { %v1255_v38 = vrot.slane %v1254_v3, 2  ;;  %v1264_v0 = vrot.slane %v1263_v34, 2 }
 0x375   :  { %v1273_v28 = vrot.slane %v1272_v49, 2  ;;  %v1282_v1 = vrot.slane %v1281_v50, 2 }
 0x376   :  { %v1256_v40 = vmax.f32 %v1254_v3, %v1255_v38  ;;  %v1265_v43 = vmax.f32 %v1263_v34, %v1264_v0 }
 0x377   :  { %v1274_v12 = vmax.f32 %v1272_v49, %v1273_v28  ;;  %v1283_v53 = vmax.f32 %v1281_v50, %v1282_v1  ;;  %v1496_v1 = vld [vmem:[%s3577_s9 + $0x30] sm:$0xff] }
 0x378   :  { %v1257_v57 = vrot.slane %v1256_v40, 1  ;;  %v1266_v58 = vrot.slane %v1265_v43, 1 }
 0x379   :  { %v1275_v26 = vrot.slane %v1274_v12, 1  ;;  %v1284_v13 = vrot.slane %v1283_v53, 1 }
 0x37a   :  { %v1258_v45 = vmax.f32 %v1256_v40, %v1257_v57  ;;  %v1267_v14 = vmax.f32 %v1265_v43, %v1266_v58  ;;  %v1495_v57 = vld [vmem:[%s3577_s9 + $0x28] sm:$0xff]  ;;  %v1494_v58 = vld [vmem:[%s3577_s9 + $0x20] sm:$0xff] }
 0x37b   :  { %v2399_v56 = vpop.eup %2398  ;;  %v1276_v2 = vmax.f32 %v1274_v12, %v1275_v26  ;;  %v1285_v0 = vmax.f32 %v1283_v53, %v1284_v13  ;;  %v1493_v12 = vld [vmem:[%s3577_s9 + $0x18] sm:$0xff] }
 0x37c   :  { %v1248_v61 = vmul.f32 %v2399_v56, %v1228_v51  ;;  %v1249_v19 = vmul.f32 %v2399_v56, %v1229_v47  ;;  %v1242_v8 = vmul.f32 %v2399_v56, %v1222_v46  ;;  %v1243_v42 = vmul.f32 %v2399_v56, %v1223_v23 }
 0x37d   :  { %v1244_v36 = vmul.f32 %v2399_v56, %v1224_v24  ;;  %v1245_v37 = vmul.f32 %v2399_v56, %v1225_v48  ;;  %v1246_v62 = vmul.f32 %v2399_v56, %v1226_v18  ;;  %v1247_v29 = vmul.f32 %v2399_v56, %v1227_v21  ;;  %v1497_v56 = vld [vmem:[%s3577_s9 + $0x38] sm:$0xff] }
 0x37e   :  { %v1313_v59 = vsel %vm1103_vm4, %v1248_v61, -inf  ;;  %v1314_v55 = vsel %vm1103_vm4, %v1249_v19, -inf  ;;  %v1286_v4 = vsel %vm1103_vm4, %v1242_v8, -inf  ;;  %v1287_v41 = vsel %vm1103_vm4, %v1243_v42, -inf  ;;  %v1492_v61 = vld [vmem:[%s3577_s9 + $0x10] sm:$0xff]  ;;  %v1491_v19 = vld [vmem:[%s3577_s9 + $0x8] sm:$0xff] }
 0x37f   :  { %v1315_v39 = vmax.f32 %v1313_v59, %v1314_v55  ;;  %v1288_v5 = vmax.f32 %v1286_v4, %v1287_v41  ;;  %v1295_v15 = vsel %vm1103_vm4, %v1244_v36, -inf  ;;  %v1296_v63 = vsel %vm1103_vm4, %v1245_v37, -inf  ;;  %v1490_v8 = vld [vmem:[%s3577_s9] sm:$0xff]  ;;  %v2094_v37 = vld [vmem:[#allocation10] ss:$0 sm:$0xff] }
 0x380   :  { %v1297_v6 = vmax.f32 %v1295_v15, %v1296_v63  ;;  %v1304_v52 = vsel %vm1103_vm4, %v1246_v62, -inf  ;;  %v1305_v32 = vsel %vm1103_vm4, %v1247_v29, -inf  ;;  %v1352_v30 = vsel %vm1351_vm5, %v1267_v14, %v1258_v45 }
 0x381   :  { %v1316_v7 = vrot.slane %v1315_v39, 4  ;;  %v1289_v10 = vrot.slane %v1288_v5, 4  ;;  %v1306_v11 = vmax.f32 %v1304_v52, %v1305_v32  ;;  %v1354_v49 = vsel %vm1353_vm6, %v1276_v2, %v1352_v30 }
 0x382   :  { %v1298_v20 = vrot.slane %v1297_v6, 4  ;;  %v1356_v47 = vsel %vm1355_vm7, %v1285_v0, %v1354_v49  ;;  %v1322_v42 = vlaneseq }
 0x383   :  { %v1317_v27 = vmax.f32 %v1315_v39, %v1316_v7  ;;  %v1290_v9 = vmax.f32 %v1288_v5, %v1289_v10  ;;  %v1307_v44 = vrot.slane %v1306_v11, 4 }
 0x384   :  { %v1299_v16 = vmax.f32 %v1297_v6, %v1298_v20  ;;  %v1323_v36 = vshrl.u32 %v1322_v42, 7  ;;  %v1636_v42 = vld [vmem:[%s3579_s11 + $0x28] sm:$0xff] }
 0x385   :  { %v1318_v60 = vrot.slane %v1317_v27, 2  ;;  %v1291_v22 = vrot.slane %v1290_v9, 2  ;;  %v1308_v17 = vmax.f32 %v1306_v11, %v1307_v44 }
 0x386   :  { %v1300_v25 = vrot.slane %v1299_v16, 2  ;;  %vm1324_vm12 = vcmp.lt.s32.totalorder %v1323_v36, 4  ;;  %v1635_v36 = vld [vmem:[%s3579_s11 + $0x20] sm:$0xff] }
 0x387   :  { %v1319_v31 = vmax.f32 %v1317_v27, %v1318_v60  ;;  %v1292_v33 = vmax.f32 %v1290_v9, %v1291_v22  ;;  %v1309_v3 = vrot.slane %v1308_v17, 2  ;;  %v3428_v62 = vsel %vm1324_vm12, 1.0, %v2612_v35 }
 0x388   :  { %v1301_v34 = vmax.f32 %v1299_v16, %v1300_v25 }
 0x389   :  { %v1293_v54 = vrot.slane %v1292_v33, 1  ;;  %v1310_v38 = vmax.f32 %v1308_v17, %v1309_v3  ;;  %v1320_v40 = vrot.slane %v1319_v31, 1 }
 0x38a   :  { %v1302_v50 = vrot.slane %v1301_v34, 1 }
 0x38b   :  { %v1294_v43 = vmax.f32 %v1292_v33, %v1293_v54  ;;  %v1311_v28 = vrot.slane %v1310_v38, 1  ;;  %v1321_v24 = vmax.f32 %v1319_v31, %v1320_v40 }
 0x38c   :  { %v1303_v51 = vmax.f32 %v1301_v34, %v1302_v50 }
 0x38d   :  { %v1312_v46 = vmax.f32 %v1310_v38, %v1311_v28  ;;  %v1358_v23 = vsel %vm1357_vm8, %v1294_v43, %v1356_v47  ;;  %v3436_v47 = vsub.f32 1.0, %v3428_v62 }
 0x38e   :  { %v1360_v48 = vsel %vm1359_vm9, %v1303_v51, %v1358_v23 }
 0x38f   :  { %v1362_v18 = vsel %vm1361_vm10, %v1312_v46, %v1360_v48 }
 0x390   :  { %v1364_v21 = vsel %vm1363_vm11, %v1321_v24, %v1362_v18 }
 0x391   :  { %2303 = vmatmul.mubr.msk.f32.vlgmr.msra.gmra.mxu1 %vm1103_vm4, %v1364_v21 }
 0x392   :  { %2321 = vmatprep.mubr.msk.f32.mxu1 %vm2613_vm3, %v2612_v35  ;;  %2306 = vmatpush3.msra.mxu1 %v1497_v56 }
 0x393   :  { %2307 = vmatprep.subr.mxu1 %v2612_v35 }
 0x394   :  { %2308 = vmatpush3.msra.mxu1 %v1496_v1 }
 0x395   :  { %2309 = vmatprep.subr.mxu1 %v2612_v35 }
 0x396   :  { %2310 = vmatpush3.msra.mxu1 %v1495_v57 }
 0x397   :  { %2311 = vmatprep.subr.mxu1 %v2612_v35 }
 0x398   :  { %2312 = vmatpush3.msra.mxu1 %v1494_v58 }
 0x399   :  { %2313 = vmatprep.subr.mxu1 %v2612_v35 }
 0x39a   :  { %2314 = vmatpush3.msra.mxu1 %v1493_v12 }
 0x39b   :  { %2315 = vmatprep.subr.mxu1 %v2612_v35 }
 0x39c   :  { %2316 = vmatpush3.msra.mxu1 %v1492_v61 }
 0x39d   :  { %2317 = vmatprep.subr.mxu1 %v2612_v35 }
 0x39e   :  { %2318 = vmatpush3.msra.mxu1 %v1491_v19  ;;  %v1638_v19 = vld [vmem:[%s3579_s11 + $0x38] sm:$0xff] }
 0x39f   :  { %2319 = vmatprep.subr.mxu1 %v2612_v35  ;;  %2325 = vmatpush3.msra.mxu0 %v1638_v19 }
 0x3a0   :  { %2320 = vmatpush3.msra.mxu1 %v1490_v8  ;;  %2326 = vmatprep.subr.mxu0 %v2612_v35  ;;  %v1637_v8 = vld [vmem:[%s3579_s11 + $0x30] sm:$0xff] }
 0x3a1   :  { %2343 = vmatprep.subr.mxu1 %v2612_v35  ;;  %2327 = vmatpush3.msra.mxu0 %v1637_v8 }
 0x3a2   :  { %2328 = vmatprep.subr.mxu0 %v2612_v35 }
 0x3a3   :  { %2329 = vmatpush3.msra.mxu0 %v1636_v42 }
 0x3a4   :  { %2330 = vmatprep.subr.mxu0 %v2612_v35 }
 0x3a5   :  { %2331 = vmatpush3.msra.mxu0 %v1635_v36 }
 0x3a6   :  { %2332 = vmatprep.subr.mxu0 %v2612_v35 }
 0x451   :  { %v1433_v29 = vpop.f32.mrf.mxu1 }
 0x452   :  { %v1434_v59 = vadd.f32 %v2094_v37, %v1433_v29  ;;  %v1634_v37 = vld [vmem:[%s3579_s11 + $0x18] sm:$0xff]  ;;  %v1633_v29 = vld [vmem:[%s3579_s11 + $0x10] sm:$0xff] }
 0x453   :  { %v2304_v55 = vpop.f32.mrf.mxu1  ;;  %2333 = vmatpush3.msra.mxu0 %v1634_v37  ;;  %v1778_v37 = vld [vmem:[%s3581_s13 + $0x38] sm:$0xff] }
 0x454   :  { %v1437_v4 = vmul.f32 %v3428_v62, %v1434_v59  ;;  %2334 = vmatprep.subr.mxu0 %v2612_v35  ;;  %v1631_v55 = vld [vmem:[%s3579_s11] sm:$0xff] }
 0x455   :  { %2335 = vmatpush3.msra.mxu0 %v1633_v29  ;;  %v1777_v29 = vld [vmem:[%s3581_s13 + $0x30] sm:$0xff] }
 0x456   :  { %v1438_v41 = vsub.f32 %v1434_v59, %v1437_v4  ;;  %v1439_v39 = vsel %vm1103_vm4, %v1437_v4, 0.0  ;;  %v1455_v5 = vmul.f32 %v1437_v4, %v1434_v59  ;;  %2336 = vmatprep.subr.mxu0 %v2612_v35  ;;  %v2096_v4 = vld [vmem:[#allocation11] ss:$0 sm:$0xff] }
 0x457   :  { %v1440_v15 = vrot.slane %v1439_v39, 4 }
 0x458   :  { %v1447_v63 = vsel %vm1103_vm4, %v1438_v41, 0.0  ;;  %v1456_v6 = vsel %vm1103_vm4, %v1455_v5, 0.0  ;;  %v1464_v52 = vmul.f32 %v1438_v41, %v1434_v59 }
 0x459   :  { %v1441_v32 = vadd.f32 %v1440_v15, %v1439_v39  ;;  %v1448_v7 = vrot.slane %v1447_v63, 4  ;;  %v1457_v26 = vrot.slane %v1456_v6, 4 }
 0x45a   :  { %v1465_v10 = vsel %vm1103_vm4, %v1464_v52, 0.0 }
 0x45b   :  { %v1442_v11 = vrot.slane %v1441_v32, 2  ;;  %v1449_v53 = vadd.f32 %v1448_v7, %v1447_v63  ;;  %v1458_v45 = vadd.f32 %v1457_v26, %v1456_v6  ;;  %v1466_v14 = vrot.slane %v1465_v10, 4 }
 0x45d   :  { %v1443_v20 = vadd.f32 %v1442_v11, %v1441_v32  ;;  %v1450_v27 = vrot.slane %v1449_v53, 2  ;;  %v1459_v9 = vrot.slane %v1458_v45, 2  ;;  %v1467_v44 = vadd.f32 %v1466_v14, %v1465_v10 }
 0x45f   :  { %v1444_v16 = vrot.slane %v1443_v20, 1  ;;  %v1451_v60 = vadd.f32 %v1450_v27, %v1449_v53  ;;  %v1460_v2 = vadd.f32 %v1459_v9, %v1458_v45  ;;  %v1468_v22 = vrot.slane %v1467_v44, 2 }
 0x461   :  { %v1445_v17 = vadd.f32 %v1444_v16, %v1443_v20  ;;  %v1452_v13 = vrot.slane %v1451_v60, 1  ;;  %v1461_v25 = vrot.slane %v1460_v2, 1  ;;  %v1469_v30 = vadd.f32 %v1468_v22, %v1467_v44 }
 0x463   :  { %v1446_v31 = vmul.f32 0.25, %v1445_v17  ;;  %v1453_v33 = vadd.f32 %v1452_v13, %v1451_v60  ;;  %v1462_v3 = vadd.f32 %v1461_v25, %v1460_v2  ;;  %v1470_v34 = vrot.slane %v1469_v30, 1 }
 0x465   :  { %v1454_v54 = vmul.f32 0.25, %v1453_v33  ;;  %v1463_v38 = vmul.f32 0.25, %v1462_v3  ;;  %v1471_v49 = vadd.f32 %v1470_v34, %v1469_v30  ;;  %v1476_v0 = vmul.f32 %v1446_v31, %v1446_v31 }
 0x466   :  { %v1473_v56 = vmul.f32 %v3428_v62, %v1446_v31 }
 0x467   :  { %v1472_v50 = vmul.f32 0.25, %v1471_v49  ;;  %v1480_v40 = vmul.f32 %v1454_v54, %v1454_v54  ;;  %v1477_v43 = vsub.f32 %v1463_v38, %v1476_v0  ;;  %v1474_v21 = vmul.f32 %v1454_v54, %v3436_v47 }
 0x469   :  { %v1481_v28 = vsub.f32 %v1472_v50, %v1480_v40  ;;  %v1478_v51 = vmax.f32 %v1477_v43, 0.0  ;;  %v1475_v1 = vadd.f32 %v1474_v21, %v1473_v56 }
 0x46b   :  { %v1482_v46 = vmax.f32 %v1481_v28, 0.0  ;;  %v1479_v23 = vmul.f32 %v3428_v62, %v1478_v51  ;;  %v1485_v57 = vsub.f32 %v1434_v59, %v1475_v1  ;;  %v1632_v59 = vld [vmem:[%s3579_s11 + $0x8] sm:$0xff] }
 0x46c   :  { %2337 = vmatpush3.msra.mxu0 %v1632_v59  ;;  %v1776_v59 = vld [vmem:[%s3581_s13 + $0x28] sm:$0xff] }
 0x46d   :  { %v1483_v24 = vmul.f32 %v1482_v46, %v3436_v47  ;;  %2338 = vmatprep.subr.mxu0 %v2612_v35 }
 0x46e   :  { %2339 = vmatpush3.msra.mxu0 %v1631_v55  ;;  %v1775_v55 = vld [vmem:[%s3581_s13 + $0x20] sm:$0xff] }
 0x46f   :  { %v1484_v48 = vadd.f32 %v1483_v24, %v1479_v23  ;;  %2362 = vmatprep.subr.mxu0 %v2612_v35 }
 0x471   :  { %v1486_v18 = vadd.f32 1e-05, %v1484_v48 }
 0x473   :  { %2400 = vrsqrt.f32 %v1486_v18 }
 0x480   :  { %v2401_v58 = vpop.eup %2400 }
 0x481   :  { %v1488_v12 = vmul.f32 %v2401_v58, %v1485_v57 }
 0x483   :  { %v1489_v61 = vmax.f32 %v1488_v12, 0.0 }
 0x485   :  { %2322 = vmatmul.mubr.msk.f32.vlgmr.msra.gmra.mxu1 %vm1103_vm4, %v1489_v61 }
 0x486   :  { %2359 = vmatprep.mubr.msk.f32.mxu1 %vm2613_vm3, %v2612_v35  ;;  %2344 = vmatpush3.msra.mxu1 %v1778_v37 }
 0x487   :  { %2345 = vmatprep.subr.mxu1 %v2612_v35 }
 0x488   :  { %2346 = vmatpush3.msra.mxu1 %v1777_v29 }
 0x489   :  { %2347 = vmatprep.subr.mxu1 %v2612_v35 }
 0x48a   :  { %2348 = vmatpush3.msra.mxu1 %v1776_v59 }
 0x48b   :  { %2349 = vmatprep.subr.mxu1 %v2612_v35 }
 0x48c   :  { %2350 = vmatpush3.msra.mxu1 %v1775_v55  ;;  %v1915_v55 = vld [vmem:[%s3583_s15 + $0x18] sm:$0xff] }
 0x48d   :  { %2351 = vmatprep.subr.mxu1 %v2612_v35 }
 0x545   :  { %v1574_v41 = vpop.f32.mrf.mxu1 }
 0x546   :  { %v1575_v39 = vadd.f32 %v2096_v4, %v1574_v41  ;;  %v1774_v4 = vld [vmem:[%s3581_s13 + $0x18] sm:$0xff]  ;;  %v1773_v41 = vld [vmem:[%s3581_s13 + $0x10] sm:$0xff] }
 0x547   :  { %v2323_v5 = vpop.f32.mrf.mxu1  ;;  %2352 = vmatpush3.msra.mxu1 %v1774_v4  ;;  %v1914_v4 = vld [vmem:[%s3583_s15 + $0x10] sm:$0xff] }
 0x548   :  { %v1578_v15 = vmul.f32 %v3428_v62, %v1575_v39  ;;  %2353 = vmatprep.subr.mxu1 %v2612_v35  ;;  %v1771_v5 = vld [vmem:[%s3581_s13] sm:$0xff] }
 0x549   :  { %2354 = vmatpush3.msra.mxu1 %v1773_v41  ;;  %v1913_v41 = vld [vmem:[%s3583_s15 + $0x8] sm:$0xff] }
 0x54a   :  { %v1579_v63 = vsub.f32 %v1575_v39, %v1578_v15  ;;  %v1580_v6 = vsel %vm1103_vm4, %v1578_v15, 0.0  ;;  %v1596_v52 = vmul.f32 %v1578_v15, %v1575_v39  ;;  %2355 = vmatprep.subr.mxu1 %v2612_v35  ;;  %v2098_v15 = vld [vmem:[#allocation13] ss:$0 sm:$0xff] }
 0x54b   :  { %v1581_v32 = vrot.slane %v1580_v6, 4 }
 0x54c   :  { %v1588_v7 = vsel %vm1103_vm4, %v1579_v63, 0.0  ;;  %v1597_v26 = vsel %vm1103_vm4, %v1596_v52, 0.0  ;;  %v1605_v10 = vmul.f32 %v1579_v63, %v1575_v39 }
 0x54d   :  { %v1582_v11 = vadd.f32 %v1581_v32, %v1580_v6  ;;  %v1589_v53 = vrot.slane %v1588_v7, 4  ;;  %v1598_v45 = vrot.slane %v1597_v26, 4 }
 0x54e   :  { %v1606_v14 = vsel %vm1103_vm4, %v1605_v10, 0.0 }
 0x54f   :  { %v1583_v20 = vrot.slane %v1582_v11, 2  ;;  %v1590_v27 = vadd.f32 %v1589_v53, %v1588_v7  ;;  %v1599_v9 = vadd.f32 %v1598_v45, %v1597_v26  ;;  %v1607_v44 = vrot.slane %v1606_v14, 4 }
 0x551   :  { %v1584_v16 = vadd.f32 %v1583_v20, %v1582_v11  ;;  %v1591_v60 = vrot.slane %v1590_v27, 2  ;;  %v1600_v2 = vrot.slane %v1599_v9, 2  ;;  %v1608_v22 = vadd.f32 %v1607_v44, %v1606_v14 }
 0x553   :  { %v1585_v17 = vrot.slane %v1584_v16, 1  ;;  %v1592_v13 = vadd.f32 %v1591_v60, %v1590_v27  ;;  %v1601_v25 = vadd.f32 %v1600_v2, %v1599_v9  ;;  %v1609_v30 = vrot.slane %v1608_v22, 2 }
 0x555   :  { %v1586_v31 = vadd.f32 %v1585_v17, %v1584_v16  ;;  %v1593_v33 = vrot.slane %v1592_v13, 1  ;;  %v1602_v3 = vrot.slane %v1601_v25, 1  ;;  %v1610_v34 = vadd.f32 %v1609_v30, %v1608_v22 }
 0x557   :  { %v1587_v54 = vmul.f32 0.25, %v1586_v31  ;;  %v1594_v38 = vadd.f32 %v1593_v33, %v1592_v13  ;;  %v1603_v49 = vadd.f32 %v1602_v3, %v1601_v25  ;;  %v1611_v0 = vrot.slane %v1610_v34, 1 }
 0x559   :  { %v1595_v50 = vmul.f32 0.25, %v1594_v38  ;;  %v1604_v40 = vmul.f32 0.25, %v1603_v49  ;;  %v1612_v43 = vadd.f32 %v1611_v0, %v1610_v34  ;;  %v1617_v28 = vmul.f32 %v1587_v54, %v1587_v54 }
 0x55a   :  { %v1614_v12 = vmul.f32 %v3428_v62, %v1587_v54 }
 0x55b   :  { %v1613_v51 = vmul.f32 0.25, %v1612_v43  ;;  %v1621_v46 = vmul.f32 %v1595_v50, %v1595_v50  ;;  %v1618_v23 = vsub.f32 %v1604_v40, %v1617_v28  ;;  %v1615_v58 = vmul.f32 %v1595_v50, %v3436_v47 }
 0x55d   :  { %v1622_v24 = vsub.f32 %v1613_v51, %v1621_v46  ;;  %v1619_v48 = vmax.f32 %v1618_v23, 0.0  ;;  %v1616_v61 = vadd.f32 %v1615_v58, %v1614_v12 }
 0x55f   :  { %v1623_v18 = vmax.f32 %v1622_v24, 0.0  ;;  %v1620_v21 = vmul.f32 %v3428_v62, %v1619_v48  ;;  %v1626_v19 = vsub.f32 %v1575_v39, %v1616_v61  ;;  %v1772_v39 = vld [vmem:[%s3581_s13 + $0x8] sm:$0xff] }
 0x560   :  { %2356 = vmatpush3.msra.mxu1 %v1772_v39  ;;  %v1912_v39 = vld [vmem:[%s3583_s15] sm:$0xff] }
 0x561   :  { %v1624_v56 = vmul.f32 %v1623_v18, %v3436_v47  ;;  %2357 = vmatprep.subr.mxu1 %v2612_v35 }
 0x562   :  { %2358 = vmatpush3.msra.mxu1 %v1771_v5  ;;  %v2100_v5 = vld [vmem:[#allocation14] ss:$0 sm:$0xff] }
 0x563   :  { %v1625_v1 = vadd.f32 %v1624_v56, %v1620_v21 }
 0x565   :  { %v1627_v57 = vadd.f32 1e-05, %v1625_v1 }
 0x567   :  { %2402 = vrsqrt.f32 %v1627_v57 }
 0x574   :  { %v2403_v8 = vpop.eup %2402 }
 0x575   :  { %v1629_v42 = vmul.f32 %v2403_v8, %v1626_v19 }
 0x577   :  { %v1630_v36 = vmax.f32 %v1629_v42, 0.0 }
 0x579   :  { %2341 = vmatmul.mubr.msk.f32.vlgmr.msra.gmra.mxu0 %vm1103_vm4, %v1630_v36 }
 0x57a   :  { %2370 = vmatprep.mubr.msk.f32.mxu0 %vm2613_vm3, %v2612_v35  ;;  %2363 = vmatpush3.msra.mxu0 %v1915_v55  ;;  %v2102_v55 = vld [vmem:[%s3584_s16] ss:$0 sm:$0xff]  ;;  %s2614_s16 = smov [#allocation16]  }
 0x57b   :  { %2364 = vmatprep.subr.mxu0 %v2612_v35  ;;  %s2029_s0 = sshll.u32 %s2614_s16, 4  ;;  %s2030_s0 = int_to_ptr.vmem [resolvable:$true] %s2029_s0 }
 0x57c   :  { %2365 = vmatpush3.msra.mxu0 %v1914_v4  ;;  %s2570_s30 = scalar_lea.vmem %s2030_s0, 16  ;;  %s2574_s6 = scalar_lea.vmem %s2030_s0, 32 }
 0x57d   :  { %2366 = vmatprep.subr.mxu0 %v2612_v35  ;;  %p2571_p12 = scmp.ne.s32.totalorder %s2030_s0, %s2570_s30  ;;  %p2575_p13 = scmp.lt.s32.totalorder %s2030_s0, %s2030_s0 }
 0x57e   :  { %2367 = vmatpush3.msra.mxu0 %v1913_v41  ;;  %p2576_p0 = scmp.lt.s32.totalorder %s2574_s6, %s2570_s30 }
 0x57f   :  { %2368 = vmatprep.subr.mxu0 %v2612_v35 }
 0x580   :  { %2369 = vmatpush3.msra.mxu0 %v1912_v39  ;;  %p2577_p1 = por %p2576_p0, %p2575_p13 }
 0x582   :  { %p2578_p2 = pnand %p2577_p1, %p2571_p12 }
 0x639   :  { %v1715_v63 = vpop.f32.mrf.mxu0 }
 0x63a   :  { %v1716_v6 = vadd.f32 %v2098_v15, %v1715_v63 }
 0x63b   :  { %v2342_v52 = vpop.f32.mrf.mxu0 }
 0x63c   :  { %v1719_v32 = vmul.f32 %v3428_v62, %v1716_v6 }
 0x63e   :  { %v1720_v7 = vsub.f32 %v1716_v6, %v1719_v32  ;;  %v1721_v26 = vsel %vm1103_vm4, %v1719_v32, 0.0  ;;  %v1737_v10 = vmul.f32 %v1719_v32, %v1716_v6 }
 0x63f   :  { %v1722_v11 = vrot.slane %v1721_v26, 4 }
 0x640   :  { %v1729_v53 = vsel %vm1103_vm4, %v1720_v7, 0.0  ;;  %v1738_v45 = vsel %vm1103_vm4, %v1737_v10, 0.0  ;;  %v1746_v14 = vmul.f32 %v1720_v7, %v1716_v6 }
 0x641   :  { %v1723_v20 = vadd.f32 %v1722_v11, %v1721_v26  ;;  %v1730_v27 = vrot.slane %v1729_v53, 4  ;;  %v1739_v9 = vrot.slane %v1738_v45, 4 }
 0x642   :  { %v1747_v44 = vsel %vm1103_vm4, %v1746_v14, 0.0 }
 0x643   :  { %v1724_v16 = vrot.slane %v1723_v20, 2  ;;  %v1731_v60 = vadd.f32 %v1730_v27, %v1729_v53  ;;  %v1740_v2 = vadd.f32 %v1739_v9, %v1738_v45  ;;  %v1748_v22 = vrot.slane %v1747_v44, 4 }
 0x645   :  { %v1725_v17 = vadd.f32 %v1724_v16, %v1723_v20  ;;  %v1732_v13 = vrot.slane %v1731_v60, 2  ;;  %v1741_v25 = vrot.slane %v1740_v2, 2  ;;  %v1749_v30 = vadd.f32 %v1748_v22, %v1747_v44 }
 0x647   :  { %v1726_v31 = vrot.slane %v1725_v17, 1  ;;  %v1733_v33 = vadd.f32 %v1732_v13, %v1731_v60  ;;  %v1742_v3 = vadd.f32 %v1741_v25, %v1740_v2  ;;  %v1750_v34 = vrot.slane %v1749_v30, 2 }
 0x649   :  { %v1727_v54 = vadd.f32 %v1726_v31, %v1725_v17  ;;  %v1734_v38 = vrot.slane %v1733_v33, 1  ;;  %v1743_v49 = vrot.slane %v1742_v3, 1  ;;  %v1751_v0 = vadd.f32 %v1750_v34, %v1749_v30 }
 0x64b   :  { %v1728_v50 = vmul.f32 0.25, %v1727_v54  ;;  %v1735_v40 = vadd.f32 %v1734_v38, %v1733_v33  ;;  %v1744_v43 = vadd.f32 %v1743_v49, %v1742_v3  ;;  %v1752_v28 = vrot.slane %v1751_v0, 1 }
 0x64d   :  { %v1736_v51 = vmul.f32 0.25, %v1735_v40  ;;  %v1745_v46 = vmul.f32 0.25, %v1744_v43  ;;  %v1753_v23 = vadd.f32 %v1752_v28, %v1751_v0  ;;  %v1758_v24 = vmul.f32 %v1728_v50, %v1728_v50 }
 0x64e   :  { %v1755_v42 = vmul.f32 %v3428_v62, %v1728_v50 }
 0x64f   :  { %v1754_v48 = vmul.f32 0.25, %v1753_v23  ;;  %v1762_v18 = vmul.f32 %v1736_v51, %v1736_v51  ;;  %v1759_v21 = vsub.f32 %v1745_v46, %v1758_v24  ;;  %v1756_v8 = vmul.f32 %v1736_v51, %v3436_v47 }
 0x651   :  { %v1763_v56 = vsub.f32 %v1754_v48, %v1762_v18  ;;  %v1760_v1 = vmax.f32 %v1759_v21, 0.0  ;;  %v1757_v36 = vadd.f32 %v1756_v8, %v1755_v42 }
 0x653   :  { %v1764_v57 = vmax.f32 %v1763_v56, 0.0  ;;  %v1761_v58 = vmul.f32 %v3428_v62, %v1760_v1  ;;  %v1767_v37 = vsub.f32 %v1716_v6, %v1757_v36 }
 0x655   :  { %v1765_v12 = vmul.f32 %v1764_v57, %v3436_v47 }
 0x657   :  { %v1766_v61 = vadd.f32 %v1765_v12, %v1761_v58 }
 0x659   :  { %v1768_v19 = vadd.f32 1e-05, %v1766_v61 }
 0x65b   :  { %2404 = vrsqrt.f32 %v1768_v19 }
 0x668   :  { %v2405_v29 = vpop.eup %2404 }
 0x669   :  { %v3529_v59 = vmul.f32 %v2405_v29, %v1767_v37 }
 0x66b   :  { %2360 = vmatmul.mubr.msk.f32.vlgmr.msra.gmra.mxu1 %vm1103_vm4, %v3529_v59  ;;  %v1996_v39 = vrot.slane %v3529_v59, 4 }
 0x72b   :  { %v1855_v15 = vpop.f32.mrf.mxu1 }
 0x72c   :  { %v1856_v63 = vadd.f32 %v2100_v5, %v1855_v15 }
 0x72d   :  { %v2361_v6 = vpop.f32.mrf.mxu1 }
 0x72e   :  { %v1859_v52 = vmul.f32 %v3428_v62, %v1856_v63  ;;  %v2005_v6 = vmul.f32 %v1996_v39, %v1996_v39 }
 0x730   :  { %v1860_v32 = vsub.f32 %v1856_v63, %v1859_v52  ;;  %v1861_v7 = vsel %vm736_vm2, %v1859_v52, 0.0  ;;  %v1877_v26 = vmul.f32 %v1859_v52, %v1856_v63  ;;  %v2006_v52 = vsel %vm1103_vm4, %v2005_v6, 0.0 }
 0x731   :  { %v1862_v10 = vrot.slane %v1861_v7, 4 }
 0x732   :  { %v1869_v11 = vsel %vm736_vm2, %v1860_v32, 0.0  ;;  %v1878_v53 = vsel %vm736_vm2, %v1877_v26, 0.0  ;;  %v1886_v45 = vmul.f32 %v1860_v32, %v1856_v63 }
 0x733   :  { %v1863_v14 = vadd.f32 %v1862_v10, %v1861_v7  ;;  %v1870_v20 = vrot.slane %v1869_v11, 4  ;;  %v1879_v35 = vrot.slane %v1878_v53, 4 }
 0x734   :  { %v1887_v27 = vsel %vm736_vm2, %v1886_v45, 0.0 }
 0x735   :  { %v1864_v9 = vrot.slane %v1863_v14, 2  ;;  %v1871_v44 = vadd.f32 %v1870_v20, %v1869_v11  ;;  %v1880_v16 = vadd.f32 %v1879_v35, %v1878_v53  ;;  %v1888_v60 = vrot.slane %v1887_v27, 4 }
 0x737   :  { %v1865_v2 = vadd.f32 %v1864_v9, %v1863_v14  ;;  %v1872_v22 = vrot.slane %v1871_v44, 2  ;;  %v1881_v17 = vrot.slane %v1880_v16, 2  ;;  %v1889_v13 = vadd.f32 %v1888_v60, %v1887_v27 }
 0x739   :  { %v1866_v25 = vrot.slane %v1865_v2, 1  ;;  %v1873_v30 = vadd.f32 %v1872_v22, %v1871_v44  ;;  %v1882_v31 = vadd.f32 %v1881_v17, %v1880_v16  ;;  %v1890_v33 = vrot.slane %v1889_v13, 2 }
 0x73b   :  { %v1867_v3 = vadd.f32 %v1866_v25, %v1865_v2  ;;  %v1874_v34 = vrot.slane %v1873_v30, 1  ;;  %v1883_v54 = vrot.slane %v1882_v31, 1  ;;  %v1891_v38 = vadd.f32 %v1890_v33, %v1889_v13 }
 0x73d   :  { %v1868_v49 = vmul.f32 0.25, %v1867_v3  ;;  %v1875_v0 = vadd.f32 %v1874_v34, %v1873_v30  ;;  %v1884_v50 = vadd.f32 %v1883_v54, %v1882_v31  ;;  %v1892_v40 = vrot.slane %v1891_v38, 1 }
 0x73f   :  { %v1876_v43 = vmul.f32 0.25, %v1875_v0  ;;  %v1885_v28 = vmul.f32 0.25, %v1884_v50  ;;  %v1893_v51 = vadd.f32 %v1892_v40, %v1891_v38  ;;  %v1898_v46 = vmul.f32 %v1868_v49, %v1868_v49 }
 0x740   :  { %v1895_v19 = vmul.f32 %v3428_v62, %v1868_v49 }
 0x741   :  { %v1894_v23 = vmul.f32 0.25, %v1893_v51  ;;  %v1902_v24 = vmul.f32 %v1876_v43, %v1876_v43  ;;  %v1899_v48 = vsub.f32 %v1885_v28, %v1898_v46  ;;  %v1896_v61 = vmul.f32 %v1876_v43, %v3436_v47 }
 0x743   :  { %v1903_v18 = vsub.f32 %v1894_v23, %v1902_v24  ;;  %v1900_v21 = vmax.f32 %v1899_v48, 0.0  ;;  %v1897_v8 = vadd.f32 %v1896_v61, %v1895_v19 }
 0x745   :  { %v1904_v56 = vmax.f32 %v1903_v18, 0.0  ;;  %v1901_v1 = vmul.f32 %v3428_v62, %v1900_v21  ;;  %v1907_v42 = vsub.f32 %v1856_v63, %v1897_v8 }
 0x747   :  { %v1905_v57 = vmul.f32 %v1904_v56, %v3436_v47 }
 0x749   :  { %v1906_v58 = vadd.f32 %v1905_v57, %v1901_v1 }
 0x74b   :  { %v1908_v12 = vadd.f32 1e-05, %v1906_v58 }
 0x74d   :  { %2406 = vrsqrt.f32 %v1908_v12 }
 0x75a   :  { %v2407_v36 = vpop.eup %2406 }
 0x75b   :  { %v1910_v37 = vmul.f32 %v2407_v36, %v1907_v42 }
 0x75d   :  { %v1911_v29 = vmax.f32 %v1910_v37, 0.0 }
 0x75f   :  { %2371 = vmatmul.mubr.msk.f32.vlgmr.msra.gmra.mxu0 %vm736_vm2, %v1911_v29 }
 0x81f   :  { %v1992_v4 = vpop.f32.mrf.mxu0 }
 0x820   :  { %v1993_v41 = vadd.f32 %v2102_v55, %v1992_v4 }
 0x821   :  { %v2372_v5 = vpop.f32.mrf.mxu0 }
 0x822   :  { %v2001_v15 = vmul.f32 %v1993_v41, %v1993_v41  ;;  %v1997_v47 = vmul.f32 %v1996_v39, %v1993_v41 }
 0x824   :  { %v2002_v62 = vsel %vm1103_vm4, %v2001_v15, 0.0  ;;  %v1998_v63 = vsel %vm1103_vm4, %v1997_v47, 0.0 }
 0x825   :  { %2003 = vadd.xlane.f32.xlu0 %v2002_v62  ;;  %1999 = vadd.xlane.f32.xlu1 %v1998_v63 }
 0x829   :  { %2007 = vadd.xlane.f32.xlu0 %v2006_v52 }
 0x8ae   :  { %v2004_v32 = vpop.xlane.xlu0 %2003  ;;  %v2000_v59 = vpop.xlane.xlu1 %1999 }
 0x8b2   :  { %v2008_v7 = vpop.xlane.xlu0 %2007 }
 0x8b3   :  { %v2009_v26 = vmul.f32 %v2008_v7, %v2004_v32 }
 0x8b5   :  { %v2010_v10 = vmax.f32 %v2009_v26, 1e-16 }
 0x8b7   :  { %2408 = vrsqrt.f32 %v2010_v10 }
 0x8c4   :  { %v2409_v11 = vpop.eup %2408 }
 0x8c5   :  { %v2012_v53 = vmul.f32 %v2409_v11, %v2000_v59 }
 0x8c7   :  { %v2013_v45 = vrot.slane %v2012_v53, 4 }
 0x8c9   :  { %v2014_v14 = vadd.f32 %v2013_v45, %v2012_v53 }
 0x8cb   :  { %v2015_v20 = vrot.slane %v2014_v14, 2 }
 0x8cd   :  { %v2016_v35 = vadd.f32 %v2015_v20, %v2014_v14 }
 0x8cf   :  { %v2017_v27 = vrot.slane %v2016_v35, 1 }
 0x8d1   :  { %v2018_v9 = vadd.f32 %v2017_v27, %v2016_v35 }
 0x8d3   :  { %v2019_v44 = vsub.f32 0.0, %v2018_v9 }
 0x8d5   :  { %v2020_v16 = vmul.f32 0.125, %v2019_v44 }
 0x8d7   :  { %2022 = vst.msk [vmem:[#allocation16] sm:$0x1] %vm2021_vm13, %v2020_v16 }
 0x8d8   :  { %2581 = shalt.err (!%p2578_p2)
}
 0x8d9   :  { %2032 = dma.vmem_to_hbm [thread:$0]  %s2030_s0, 16, %s3585_s17, [#allocation4]  }
 0x8da   :  { %2600 = dma.done.wait [#allocation4], 16  }
 0x8db   :  { %2601 = vsyncadd [#allocation4], 4294967280 }
 0x8dc   :  { %2036 = vsyncpa [#allocation3], 1 }
 0x8dd   :  { %2037 = vsyncpa [#allocation6], 1 }
 0x8de   :  { %2038 = vsyncpa [#allocation9], 1 }
 0x8df   :  { %2039 = vsyncpa [#allocation12], 1 }
 0x8e0   :  { %2040 = vsyncpa [#allocation15], 1 }
 0x8e1   :  { %2041 = vsyncpa [#allocation4], 1 }

</bundles_post_ra>
